<compile_context>
chip_gen: v6e
topology: v6e:2x2x1
jax: 0.10.0
libtpu: 0.0.40
codegen_flags: <defaults>
</compile_context>

<pallas_src>
import numpy as np
import jax
import jax.numpy as jnp
from jax.experimental import pallas as pl
from jax.experimental.pallas import tpu as pltpu  # noqa: F401  (kept for VMEM/params when scaling up)

PAD = 0

# Hyperparameters (small, consistent with Encoder.__init__ signature).
N_SRC_VOCAB = 16
LEN_MAX_SEQ = 8
D_WORD_VEC = 32
N_LAYERS = 2
N_HEAD = 4
D_K = 8
D_V = 8
D_MODEL = 32
D_INNER = 64
LN_EPS = 1e-5


def get_absolute_position_table(n_position, d_hid, padding_idx=None):
    """Sinusoidal position table, identical to the PyTorch reference."""
    pos = np.arange(n_position)[:, None].astype(np.float64)
    hid = np.arange(d_hid)[None, :]
    angle = pos / np.power(10000.0, 2.0 * (hid // 2) / d_hid)
    table = np.zeros((n_position, d_hid), dtype=np.float64)
    table[:, 0::2] = np.sin(angle[:, 0::2])
    table[:, 1::2] = np.cos(angle[:, 1::2])
    if padding_idx is not None:
        table[padding_idx] = 0.0
    return jnp.asarray(table, dtype=jnp.float32)


# ----------------------------- Pallas kernel ---------------------------------
def _make_encoder_kernel(B, S):
    """Whole-encoder kernel (all layers, all batch) closed over static B, S."""
    BS = B * S
    QKW = N_HEAD * D_K          # width of the Q (and K) chunk of the packed QKV output
    VW = N_HEAD * D_V           # width of the V chunk

    def kernel(x_ref, kpad_ref, npm_ref,
               wqkv_ref, bqkv_ref, wfc_ref, bfc_ref, ln1g_ref, ln1b_ref,
               w1_ref, b1_ref, w2_ref, b2_ref, ln2g_ref, ln2b_ref,
               out_ref):
        x = x_ref[...]                                                  # (B*S, D) f32

        # --- Hoisted broadcasts: built ONCE, reused by every layer / head ----------
        npm_b = jnp.broadcast_to(npm_ref[...], (BS, D_MODEL))           # (B*S, D)
        neg_bias = jnp.broadcast_to(
            (kpad_ref[...] * jnp.float32(-1e9))[:, None, :], (B, S, S))  # (B, S, S)

        for l in range(N_LAYERS):                        # static unroll over layers
            # ---- Multi-head self attention: packed QKV projection (one MXU pass) ----
            # 1/sqrt(d_k) is already folded into the Q columns of wqkv (init-time).
            qkv = jnp.dot(x, wqkv_ref[l],
                          preferred_element_type=jnp.float32) + bqkv_ref[l]  # (B*S, 96)
            qkv3 = qkv.reshape(B, S, 2 * QKW + VW)       # single un-flatten per layer

            # Output projection accumulated per head: concat_h(O_h) @ Wfc
            #   == sum_h O_h @ Wfc[h]   -> no scratch slab, no masked lane stores.
            proj = x + bfc_ref[l]                        # residual + fc bias, (B*S, D)

            for h in range(N_HEAD):                      # static unroll over heads
                qh = qkv3[:, :, h * D_K:(h + 1) * D_K]                       # (B,S,d_k)
                kh = qkv3[:, :, QKW + h * D_K: QKW + (h + 1) * D_K]          # (B,S,d_k)
                vh = qkv3[:, :, 2 * QKW + h * D_V: 2 * QKW + (h + 1) * D_V]  # (B,S,d_v)

                s = jnp.einsum('bqd,bkd->bqk', qh, kh,
                               preferred_element_type=jnp.float32)           # (B,S,S)
                s = s + neg_bias                          # masked_fill(mask, -inf) equiv.
                s = s - jnp.max(s, axis=-1, keepdims=True)
                p = jnp.exp(s)
                # Denominator >= 1 after max-subtraction (exp(0) term always present);
                # the max() guard only protects the approx reciprocal if masking changes.
                denom = jnp.maximum(jnp.sum(p, axis=-1, keepdims=True),
                                    jnp.float32(1e-6))
                p = p * pl.reciprocal(denom, approx=True)
                oh = jnp.einsum('bqk,bkd->bqd', p, vh,
                                preferred_element_type=jnp.float32)          # (B,S,d_v)
                proj = proj + jnp.dot(oh.reshape(BS, D_V), wfc_ref[l, h],
                                      preferred_element_type=jnp.float32)    # (B*S, D)

            # LayerNorm(attn_out + residual), then *= non_pad_mask
            mu1 = jnp.mean(proj, axis=-1, keepdims=True)
            var1 = jnp.mean(jnp.square(proj - mu1), axis=-1, keepdims=True)
            h1 = (proj - mu1) * jax.lax.rsqrt(var1 + LN_EPS) * ln1g_ref[l] + ln1b_ref[l]
            h1 = h1 * npm_b

            # ---- Position-wise feed forward (1x1 convs == per-token matmuls) ----
            ff = jnp.dot(h1, w1_ref[l], preferred_element_type=jnp.float32) + b1_ref[l]
            ff = jnp.maximum(ff, 0.0)
            ff = jnp.dot(ff, w2_ref[l], preferred_element_type=jnp.float32) + b2_ref[l]
            h2 = ff + h1
            mu2 = jnp.mean(h2, axis=-1, keepdims=True)
            var2 = jnp.mean(jnp.square(h2 - mu2), axis=-1, keepdims=True)
            h2 = (h2 - mu2) * jax.lax.rsqrt(var2 + LN_EPS) * ln2g_ref[l] + ln2b_ref[l]
            x = h2 * npm_b                               # enc_output *= non_pad_mask

        out_ref[...] = x.astype(out_ref.dtype)

    return kernel


def encoder_pallas(enc_flat, key_pad, non_pad_flat, W):
    """One fused pallas_call for the whole encoder (all layers, all batch)."""
    BS, D = enc_flat.shape
    B, S = key_pad.shape
    kernel = _make_encoder_kernel(B, S)
    weights = [W['wqkv'], W['bqkv'], W['wfc'], W['bfc'], W['ln1g'], W['ln1b'],
               W['w1'], W['b1'], W['w2'], W['b2'], W['ln2g'], W['ln2b']]
    return pl.pallas_call(
        kernel,
        out_shape=jax.ShapeDtypeStruct((BS, D), jnp.float32),
        # grid=(): single invocation, everything (weights + activations, <100 KB)
        # resident in VMEM; weights are loaded once, not double-buffered.
    )(enc_flat, key_pad, non_pad_flat, *weights)


# ----------------------------- Parameters / glue ------------------------------
def init_params(key):
    keys = jax.random.split(key, 1 + N_LAYERS * 6)
    word_emb = jax.random.normal(keys[0], (N_SRC_VOCAB, D_WORD_VEC), jnp.float32) * 0.1
    word_emb = word_emb.at[PAD].set(0.0)                  # padding_idx=PAD row is zero
    pos_table = get_absolute_position_table(LEN_MAX_SEQ + 1, D_WORD_VEC, padding_idx=0)

    def nrm(k, shape, std):
        return jax.random.normal(k, shape, jnp.float32) * std

    inv_temp = 1.0 / float(np.sqrt(D_K))
    per_layer = []
    ki = 1
    for _ in range(N_LAYERS):
        wq = nrm(keys[ki + 0], (D_MODEL, N_HEAD * D_K), (2.0 / (D_MODEL + D_K)) ** 0.5)
        wk = nrm(keys[ki + 1], (D_MODEL, N_HEAD * D_K), (2.0 / (D_MODEL + D_K)) ** 0.5)
        wv = nrm(keys[ki + 2], (D_MODEL, N_HEAD * D_V), (2.0 / (D_MODEL + D_V)) ** 0.5)
        # Fold the 1/sqrt(d_k) attention temperature into the Q projection (one-time,
        # host-side).  A nonzero Q bias would need the same scaling; ours is zero.
        wq = wq * inv_temp
        wfc_full = nrm(keys[ki + 3], (N_HEAD * D_V, D_MODEL), (1.0 / D_MODEL) ** 0.5)
        lp = dict(
            # Packed QKV projection: wq | wk | wv  -> (D_MODEL, 3*n_head*d_k)
            wqkv=jnp.concatenate([wq, wk, wv], axis=1),
            bqkv=jnp.zeros((1, 2 * N_HEAD * D_K + N_HEAD * D_V), jnp.float32),
            # Head-major split of W_fc so the kernel indexes a head's slice on a major
            # axis (no lane slicing / scratch-slab assembly inside the kernel).
            wfc=wfc_full.reshape(N_HEAD, D_V, D_MODEL),
            bfc=jnp.zeros((1, D_MODEL), jnp.float32),
            ln1g=jnp.ones((1, D_MODEL), jnp.float32),
            ln1b=jnp.zeros((1, D_MODEL), jnp.float32),
            w1=nrm(keys[ki + 4], (D_MODEL, D_INNER), (1.0 / D_MODEL) ** 0.5),
            b1=jnp.zeros((1, D_INNER), jnp.float32),
            w2=nrm(keys[ki + 5], (D_INNER, D_MODEL), (1.0 / D_INNER) ** 0.5),
            b2=jnp.zeros((1, D_MODEL), jnp.float32),
            ln2g=jnp.ones((1, D_MODEL), jnp.float32),
            ln2b=jnp.zeros((1, D_MODEL), jnp.float32),
        )
        per_layer.append(lp)
        ki += 6
    # Stack each parameter across layers -> single kernel input per parameter kind.
    stacked = {name: jnp.stack([lp[name] for lp in per_layer], axis=0)
               for name in per_layer[0]}
    return dict(word_emb=word_emb, pos_table=pos_table, layers=stacked)


def encoder_forward(params, src_seq, src_pos):
    B, S = src_seq.shape
    # get_non_pad_mask: 1.0 where token != PAD, flattened to (B*S, 1)
    non_pad_flat = (src_seq != PAD).astype(jnp.float32).reshape(B * S, 1)
    # get_attn_key_pad_mask: only the (B, S) key-pad vector is shipped; broadcast to
    # the (B, S, S) additive bias happens once inside the kernel.
    key_pad = (src_seq == PAD).astype(jnp.float32)
    # Embedding lookups (plain-JAX glue; gather has no clean tiny-Pallas equivalent).
    # TODO(synk): embedding gather + positional table lookup kept outside the kernel.
    enc = params['word_emb'][src_seq] + params['pos_table'][src_pos]    # (B, S, D)
    out_flat = encoder_pallas(enc.reshape(B * S, D_WORD_VEC), key_pad,
                              non_pad_flat, params['layers'])
    return out_flat.reshape(B, S, D_MODEL)


if __name__ == "__main__":
    key = jax.random.PRNGKey(0)
    pkey, dkey = jax.random.split(key)
    params = init_params(pkey)

    B, S = 2, LEN_MAX_SEQ
    tok = jax.random.randint(dkey, (B, S), 1, N_SRC_VOCAB)
    lengths = jnp.array([S, S - 2])                  # second sequence has 2 PAD tokens
    pos = jnp.arange(1, S + 1)[None, :]
    valid = pos <= lengths[:, None]
    src_seq = jnp.where(valid, tok, PAD).astype(jnp.int32)
    src_pos = jnp.where(valid, pos, 0).astype(jnp.int32)

    out = encoder_forward(params, src_seq, src_pos)
    out = jax.block_until_ready(out)
    assert out.shape == (B, S, D_MODEL)
    assert bool(jnp.all(jnp.isfinite(out)))
    print("KERNEL_OK")
</pallas_src>

<mosaic_0001>
module attributes {stable_mosaic.version = 11 : i64} {
  func.func @kernel(%arg0: memref<16x32xf32, #tpu.memory_space<vmem>>, %arg1: memref<2x8xf32, #tpu.memory_space<vmem>>, %arg2: memref<16x1xf32, #tpu.memory_space<vmem>>, %arg3: memref<2x32x96xf32, #tpu.memory_space<vmem>>, %arg4: memref<2x1x96xf32, #tpu.memory_space<vmem>>, %arg5: memref<2x4x8x32xf32, #tpu.memory_space<vmem>>, %arg6: memref<2x1x32xf32, #tpu.memory_space<vmem>>, %arg7: memref<2x1x32xf32, #tpu.memory_space<vmem>>, %arg8: memref<2x1x32xf32, #tpu.memory_space<vmem>>, %arg9: memref<2x32x64xf32, #tpu.memory_space<vmem>>, %arg10: memref<2x1x64xf32, #tpu.memory_space<vmem>>, %arg11: memref<2x64x32xf32, #tpu.memory_space<vmem>>, %arg12: memref<2x1x32xf32, #tpu.memory_space<vmem>>, %arg13: memref<2x1x32xf32, #tpu.memory_space<vmem>>, %arg14: memref<2x1x32xf32, #tpu.memory_space<vmem>>, %arg15: memref<16x32xf32, #tpu.memory_space<vmem>>) attributes {dimension_semantics = [], scalar_prefetch = 0 : i64, scratch_operands = 0 : i64, tpu.core_type = #tpu.core_type<tc>} {
    %c0 = arith.constant 0 : index
    %c0_0 = arith.constant 0 : index
    %0 = vector.load %arg0[%c0, %c0_0] : memref<16x32xf32, #tpu.memory_space<vmem>>, vector<16x32xf32>
    %c0_1 = arith.constant 0 : index
    %c0_2 = arith.constant 0 : index
    %1 = vector.load %arg2[%c0_1, %c0_2] : memref<16x1xf32, #tpu.memory_space<vmem>>, vector<16x1xf32>
    %2 = vector.shape_cast %1 : vector<16x1xf32> to vector<16x1xf32>
    %3 = vector.broadcast %2 : vector<16x1xf32> to vector<16x32xf32>
    %c0_3 = arith.constant 0 : index
    %c0_4 = arith.constant 0 : index
    %4 = vector.load %arg1[%c0_3, %c0_4] : memref<2x8xf32, #tpu.memory_space<vmem>>, vector<2x8xf32>
    %cst = arith.constant -1.000000e+09 : f32
    %5 = vector.broadcast %cst : f32 to vector<2x8xf32>
    %6 = arith.mulf %4, %5 : vector<2x8xf32>
    %7 = vector.shape_cast %6 : vector<2x8xf32> to vector<2x1x8xf32>
    %8 = vector.shape_cast %7 : vector<2x1x8xf32> to vector<2x1x8xf32>
    %9 = vector.broadcast %8 : vector<2x1x8xf32> to vector<2x8x8xf32>
    %c0_5 = arith.constant 0 : index
    %c0_6 = arith.constant 0 : index
    %c0_7 = arith.constant 0 : index
    %10 = vector.load %arg3[%c0_5, %c0_6, %c0_7] : memref<2x32x96xf32, #tpu.memory_space<vmem>>, vector<1x32x96xf32>
    %11 = vector.shape_cast %10 : vector<1x32x96xf32> to vector<32x96xf32>
    %cst_8 = arith.constant dense<0.000000e+00> : vector<16x96xf32>
    %12 = tpu.matmul %0, %11, %cst_8 {dimension_numbers = #tpu.dot_dimension_numbers<[1], [0], [0], [1], [0, 0, 1, 1], [], []>} : vector<16x32xf32>, vector<32x96xf32>, vector<16x96xf32> -> vector<16x96xf32>
    %c0_9 = arith.constant 0 : index
    %c0_10 = arith.constant 0 : index
    %c0_11 = arith.constant 0 : index
    %13 = vector.load %arg4[%c0_9, %c0_10, %c0_11] : memref<2x1x96xf32, #tpu.memory_space<vmem>>, vector<1x1x96xf32>
    %14 = vector.shape_cast %13 : vector<1x1x96xf32> to vector<1x96xf32>
    %15 = vector.broadcast %14 : vector<1x96xf32> to vector<16x96xf32>
    %16 = arith.addf %12, %15 : vector<16x96xf32>
    %17 = vector.shape_cast %16 : vector<16x96xf32> to vector<2x8x96xf32>
    %c0_12 = arith.constant 0 : index
    %c0_13 = arith.constant 0 : index
    %c0_14 = arith.constant 0 : index
    %18 = vector.load %arg6[%c0_12, %c0_13, %c0_14] : memref<2x1x32xf32, #tpu.memory_space<vmem>>, vector<1x1x32xf32>
    %19 = vector.shape_cast %18 : vector<1x1x32xf32> to vector<1x32xf32>
    %20 = vector.broadcast %19 : vector<1x32xf32> to vector<16x32xf32>
    %21 = arith.addf %0, %20 : vector<16x32xf32>
    %22 = vector.extract_strided_slice %17 {offsets = [0, 0, 0], sizes = [2, 8, 8], strides = [1, 1, 1]} : vector<2x8x96xf32> to vector<2x8x8xf32>
    %23 = vector.extract_strided_slice %17 {offsets = [0, 0, 32], sizes = [2, 8, 8], strides = [1, 1, 1]} : vector<2x8x96xf32> to vector<2x8x8xf32>
    %24 = vector.extract_strided_slice %17 {offsets = [0, 0, 64], sizes = [2, 8, 8], strides = [1, 1, 1]} : vector<2x8x96xf32> to vector<2x8x8xf32>
    "tpu.trace_start"() <{level = 10 : i32, message = "bqd,bkd->bqk"}> : () -> ()
    %cst_15 = arith.constant dense<0.000000e+00> : vector<2x8x8xf32>
    %25 = tpu.matmul %22, %23, %cst_15 {dimension_numbers = #tpu.dot_dimension_numbers<[2], [2], [1], [1], [0, 0, 0, 1, 1, 1], [0], [0]>} : vector<2x8x8xf32>, vector<2x8x8xf32>, vector<2x8x8xf32> -> vector<2x8x8xf32>
    "tpu.trace_stop"() : () -> ()
    %26 = arith.addf %25, %9 : vector<2x8x8xf32>
    %cst_16 = arith.constant dense<0xFF800000> : vector<2x8xf32>
    %27 = vector.multi_reduction <maximumf>, %26, %cst_16 [2] : vector<2x8x8xf32> to vector<2x8xf32>
    %28 = vector.shape_cast %27 : vector<2x8xf32> to vector<2x8x1xf32>
    %29 = vector.broadcast %28 : vector<2x8x1xf32> to vector<2x8x8xf32>
    %30 = arith.subf %26, %29 : vector<2x8x8xf32>
    %31 = math.exp %30 : vector<2x8x8xf32>
    %cst_17 = arith.constant dense<0.000000e+00> : vector<2x8xf32>
    %32 = vector.multi_reduction <add>, %31, %cst_17 [2] : vector<2x8x8xf32> to vector<2x8xf32>
    %33 = vector.shape_cast %32 : vector<2x8xf32> to vector<2x8x1xf32>
    %cst_18 = arith.constant 9.99999997E-7 : f32
    %34 = vector.broadcast %cst_18 : f32 to vector<2x8x1xf32>
    %35 = arith.maximumf %33, %34 : vector<2x8x1xf32>
    %36 = tpu.reciprocal %35 {approx = true} : vector<2x8x1xf32> -> vector<2x8x1xf32>
    %37 = vector.broadcast %36 : vector<2x8x1xf32> to vector<2x8x8xf32>
    %38 = arith.mulf %31, %37 : vector<2x8x8xf32>
    "tpu.trace_start"() <{level = 10 : i32, message = "bqk,bkd->bqd"}> : () -> ()
    %cst_19 = arith.constant dense<0.000000e+00> : vector<2x8x8xf32>
    %39 = tpu.matmul %38, %24, %cst_19 {dimension_numbers = #tpu.dot_dimension_numbers<[2], [1], [1], [2], [0, 0, 0, 1, 1, 2], [0], [0]>} : vector<2x8x8xf32>, vector<2x8x8xf32>, vector<2x8x8xf32> -> vector<2x8x8xf32>
    "tpu.trace_stop"() : () -> ()
    %40 = vector.shape_cast %39 : vector<2x8x8xf32> to vector<16x8xf32>
    %c0_20 = arith.constant 0 : index
    %c0_21 = arith.constant 0 : index
    %c0_22 = arith.constant 0 : index
    %c0_23 = arith.constant 0 : index
    %41 = vector.load %arg5[%c0_20, %c0_21, %c0_22, %c0_23] : memref<2x4x8x32xf32, #tpu.memory_space<vmem>>, vector<1x1x8x32xf32>
    %42 = vector.shape_cast %41 : vector<1x1x8x32xf32> to vector<8x32xf32>
    %cst_24 = arith.constant dense<0.000000e+00> : vector<16x32xf32>
    %43 = tpu.matmul %40, %42, %cst_24 {dimension_numbers = #tpu.dot_dimension_numbers<[1], [0], [0], [1], [0, 0, 1, 1], [], []>} : vector<16x8xf32>, vector<8x32xf32>, vector<16x32xf32> -> vector<16x32xf32>
    %44 = arith.addf %21, %43 : vector<16x32xf32>
    %45 = vector.extract_strided_slice %17 {offsets = [0, 0, 8], sizes = [2, 8, 8], strides = [1, 1, 1]} : vector<2x8x96xf32> to vector<2x8x8xf32>
    %46 = vector.extract_strided_slice %17 {offsets = [0, 0, 40], sizes = [2, 8, 8], strides = [1, 1, 1]} : vector<2x8x96xf32> to vector<2x8x8xf32>
    %47 = vector.extract_strided_slice %17 {offsets = [0, 0, 72], sizes = [2, 8, 8], strides = [1, 1, 1]} : vector<2x8x96xf32> to vector<2x8x8xf32>
    "tpu.trace_start"() <{level = 10 : i32, message = "bqd,bkd->bqk"}> : () -> ()
    %cst_25 = arith.constant dense<0.000000e+00> : vector<2x8x8xf32>
    %48 = tpu.matmul %45, %46, %cst_25 {dimension_numbers = #tpu.dot_dimension_numbers<[2], [2], [1], [1], [0, 0, 0, 1, 1, 1], [0], [0]>} : vector<2x8x8xf32>, vector<2x8x8xf32>, vector<2x8x8xf32> -> vector<2x8x8xf32>
    "tpu.trace_stop"() : () -> ()
    %49 = arith.addf %48, %9 : vector<2x8x8xf32>
    %cst_26 = arith.constant dense<0xFF800000> : vector<2x8xf32>
    %50 = vector.multi_reduction <maximumf>, %49, %cst_26 [2] : vector<2x8x8xf32> to vector<2x8xf32>
    %51 = vector.shape_cast %50 : vector<2x8xf32> to vector<2x8x1xf32>
    %52 = vector.broadcast %51 : vector<2x8x1xf32> to vector<2x8x8xf32>
    %53 = arith.subf %49, %52 : vector<2x8x8xf32>
    %54 = math.exp %53 : vector<2x8x8xf32>
    %cst_27 = arith.constant dense<0.000000e+00> : vector<2x8xf32>
    %55 = vector.multi_reduction <add>, %54, %cst_27 [2] : vector<2x8x8xf32> to vector<2x8xf32>
    %56 = vector.shape_cast %55 : vector<2x8xf32> to vector<2x8x1xf32>
    %cst_28 = arith.constant 9.99999997E-7 : f32
    %57 = vector.broadcast %cst_28 : f32 to vector<2x8x1xf32>
    %58 = arith.maximumf %56, %57 : vector<2x8x1xf32>
    %59 = tpu.reciprocal %58 {approx = true} : vector<2x8x1xf32> -> vector<2x8x1xf32>
    %60 = vector.broadcast %59 : vector<2x8x1xf32> to vector<2x8x8xf32>
    %61 = arith.mulf %54, %60 : vector<2x8x8xf32>
    "tpu.trace_start"() <{level = 10 : i32, message = "bqk,bkd->bqd"}> : () -> ()
    %cst_29 = arith.constant dense<0.000000e+00> : vector<2x8x8xf32>
    %62 = tpu.matmul %61, %47, %cst_29 {dimension_numbers = #tpu.dot_dimension_numbers<[2], [1], [1], [2], [0, 0, 0, 1, 1, 2], [0], [0]>} : vector<2x8x8xf32>, vector<2x8x8xf32>, vector<2x8x8xf32> -> vector<2x8x8xf32>
    "tpu.trace_stop"() : () -> ()
    %63 = vector.shape_cast %62 : vector<2x8x8xf32> to vector<16x8xf32>
    %c0_30 = arith.constant 0 : index
    %c1 = arith.constant 1 : index
    %c0_31 = arith.constant 0 : index
    %c0_32 = arith.constant 0 : index
    %64 = vector.load %arg5[%c0_30, %c1, %c0_31, %c0_32] : memref<2x4x8x32xf32, #tpu.memory_space<vmem>>, vector<1x1x8x32xf32>
    %65 = vector.shape_cast %64 : vector<1x1x8x32xf32> to vector<8x32xf32>
    %cst_33 = arith.constant dense<0.000000e+00> : vector<16x32xf32>
    %66 = tpu.matmul %63, %65, %cst_33 {dimension_numbers = #tpu.dot_dimension_numbers<[1], [0], [0], [1], [0, 0, 1, 1], [], []>} : vector<16x8xf32>, vector<8x32xf32>, vector<16x32xf32> -> vector<16x32xf32>
    %67 = arith.addf %44, %66 : vector<16x32xf32>
    %68 = vector.extract_strided_slice %17 {offsets = [0, 0, 16], sizes = [2, 8, 8], strides = [1, 1, 1]} : vector<2x8x96xf32> to vector<2x8x8xf32>
    %69 = vector.extract_strided_slice %17 {offsets = [0, 0, 48], sizes = [2, 8, 8], strides = [1, 1, 1]} : vector<2x8x96xf32> to vector<2x8x8xf32>
    %70 = vector.extract_strided_slice %17 {offsets = [0, 0, 80], sizes = [2, 8, 8], strides = [1, 1, 1]} : vector<2x8x96xf32> to vector<2x8x8xf32>
    "tpu.trace_start"() <{level = 10 : i32, message = "bqd,bkd->bqk"}> : () -> ()
    %cst_34 = arith.constant dense<0.000000e+00> : vector<2x8x8xf32>
    %71 = tpu.matmul %68, %69, %cst_34 {dimension_numbers = #tpu.dot_dimension_numbers<[2], [2], [1], [1], [0, 0, 0, 1, 1, 1], [0], [0]>} : vector<2x8x8xf32>, vector<2x8x8xf32>, vector<2x8x8xf32> -> vector<2x8x8xf32>
    "tpu.trace_stop"() : () -> ()
    %72 = arith.addf %71, %9 : vector<2x8x8xf32>
    %cst_35 = arith.constant dense<0xFF800000> : vector<2x8xf32>
    %73 = vector.multi_reduction <maximumf>, %72, %cst_35 [2] : vector<2x8x8xf32> to vector<2x8xf32>
    %74 = vector.shape_cast %73 : vector<2x8xf32> to vector<2x8x1xf32>
    %75 = vector.broadcast %74 : vector<2x8x1xf32> to vector<2x8x8xf32>
    %76 = arith.subf %72, %75 : vector<2x8x8xf32>
    %77 = math.exp %76 : vector<2x8x8xf32>
    %cst_36 = arith.constant dense<0.000000e+00> : vector<2x8xf32>
    %78 = vector.multi_reduction <add>, %77, %cst_36 [2] : vector<2x8x8xf32> to vector<2x8xf32>
    %79 = vector.shape_cast %78 : vector<2x8xf32> to vector<2x8x1xf32>
    %cst_37 = arith.constant 9.99999997E-7 : f32
    %80 = vector.broadcast %cst_37 : f32 to vector<2x8x1xf32>
    %81 = arith.maximumf %79, %80 : vector<2x8x1xf32>
    %82 = tpu.reciprocal %81 {approx = true} : vector<2x8x1xf32> -> vector<2x8x1xf32>
    %83 = vector.broadcast %82 : vector<2x8x1xf32> to vector<2x8x8xf32>
    %84 = arith.mulf %77, %83 : vector<2x8x8xf32>
    "tpu.trace_start"() <{level = 10 : i32, message = "bqk,bkd->bqd"}> : () -> ()
    %cst_38 = arith.constant dense<0.000000e+00> : vector<2x8x8xf32>
    %85 = tpu.matmul %84, %70, %cst_38 {dimension_numbers = #tpu.dot_dimension_numbers<[2], [1], [1], [2], [0, 0, 0, 1, 1, 2], [0], [0]>} : vector<2x8x8xf32>, vector<2x8x8xf32>, vector<2x8x8xf32> -> vector<2x8x8xf32>
    "tpu.trace_stop"() : () -> ()
    %86 = vector.shape_cast %85 : vector<2x8x8xf32> to vector<16x8xf32>
    %c0_39 = arith.constant 0 : index
    %c2 = arith.constant 2 : index
    %c0_40 = arith.constant 0 : index
    %c0_41 = arith.constant 0 : index
    %87 = vector.load %arg5[%c0_39, %c2, %c0_40, %c0_41] : memref<2x4x8x32xf32, #tpu.memory_space<vmem>>, vector<1x1x8x32xf32>
    %88 = vector.shape_cast %87 : vector<1x1x8x32xf32> to vector<8x32xf32>
    %cst_42 = arith.constant dense<0.000000e+00> : vector<16x32xf32>
    %89 = tpu.matmul %86, %88, %cst_42 {dimension_numbers = #tpu.dot_dimension_numbers<[1], [0], [0], [1], [0, 0, 1, 1], [], []>} : vector<16x8xf32>, vector<8x32xf32>, vector<16x32xf32> -> vector<16x32xf32>
    %90 = arith.addf %67, %89 : vector<16x32xf32>
    %91 = vector.extract_strided_slice %17 {offsets = [0, 0, 24], sizes = [2, 8, 8], strides = [1, 1, 1]} : vector<2x8x96xf32> to vector<2x8x8xf32>
    %92 = vector.extract_strided_slice %17 {offsets = [0, 0, 56], sizes = [2, 8, 8], strides = [1, 1, 1]} : vector<2x8x96xf32> to vector<2x8x8xf32>
    %93 = vector.extract_strided_slice %17 {offsets = [0, 0, 88], sizes = [2, 8, 8], strides = [1, 1, 1]} : vector<2x8x96xf32> to vector<2x8x8xf32>
    "tpu.trace_start"() <{level = 10 : i32, message = "bqd,bkd->bqk"}> : () -> ()
    %cst_43 = arith.constant dense<0.000000e+00> : vector<2x8x8xf32>
    %94 = tpu.matmul %91, %92, %cst_43 {dimension_numbers = #tpu.dot_dimension_numbers<[2], [2], [1], [1], [0, 0, 0, 1, 1, 1], [0], [0]>} : vector<2x8x8xf32>, vector<2x8x8xf32>, vector<2x8x8xf32> -> vector<2x8x8xf32>
    "tpu.trace_stop"() : () -> ()
    %95 = arith.addf %94, %9 : vector<2x8x8xf32>
    %cst_44 = arith.constant dense<0xFF800000> : vector<2x8xf32>
    %96 = vector.multi_reduction <maximumf>, %95, %cst_44 [2] : vector<2x8x8xf32> to vector<2x8xf32>
    %97 = vector.shape_cast %96 : vector<2x8xf32> to vector<2x8x1xf32>
    %98 = vector.broadcast %97 : vector<2x8x1xf32> to vector<2x8x8xf32>
    %99 = arith.subf %95, %98 : vector<2x8x8xf32>
    %100 = math.exp %99 : vector<2x8x8xf32>
    %cst_45 = arith.constant dense<0.000000e+00> : vector<2x8xf32>
    %101 = vector.multi_reduction <add>, %100, %cst_45 [2] : vector<2x8x8xf32> to vector<2x8xf32>
    %102 = vector.shape_cast %101 : vector<2x8xf32> to vector<2x8x1xf32>
    %cst_46 = arith.constant 9.99999997E-7 : f32
    %103 = vector.broadcast %cst_46 : f32 to vector<2x8x1xf32>
    %104 = arith.maximumf %102, %103 : vector<2x8x1xf32>
    %105 = tpu.reciprocal %104 {approx = true} : vector<2x8x1xf32> -> vector<2x8x1xf32>
    %106 = vector.broadcast %105 : vector<2x8x1xf32> to vector<2x8x8xf32>
    %107 = arith.mulf %100, %106 : vector<2x8x8xf32>
    "tpu.trace_start"() <{level = 10 : i32, message = "bqk,bkd->bqd"}> : () -> ()
    %cst_47 = arith.constant dense<0.000000e+00> : vector<2x8x8xf32>
    %108 = tpu.matmul %107, %93, %cst_47 {dimension_numbers = #tpu.dot_dimension_numbers<[2], [1], [1], [2], [0, 0, 0, 1, 1, 2], [0], [0]>} : vector<2x8x8xf32>, vector<2x8x8xf32>, vector<2x8x8xf32> -> vector<2x8x8xf32>
    "tpu.trace_stop"() : () -> ()
    %109 = vector.shape_cast %108 : vector<2x8x8xf32> to vector<16x8xf32>
    %c0_48 = arith.constant 0 : index
    %c3 = arith.constant 3 : index
    %c0_49 = arith.constant 0 : index
    %c0_50 = arith.constant 0 : index
    %110 = vector.load %arg5[%c0_48, %c3, %c0_49, %c0_50] : memref<2x4x8x32xf32, #tpu.memory_space<vmem>>, vector<1x1x8x32xf32>
    %111 = vector.shape_cast %110 : vector<1x1x8x32xf32> to vector<8x32xf32>
    %cst_51 = arith.constant dense<0.000000e+00> : vector<16x32xf32>
    %112 = tpu.matmul %109, %111, %cst_51 {dimension_numbers = #tpu.dot_dimension_numbers<[1], [0], [0], [1], [0, 0, 1, 1], [], []>} : vector<16x8xf32>, vector<8x32xf32>, vector<16x32xf32> -> vector<16x32xf32>
    %113 = arith.addf %90, %112 : vector<16x32xf32>
    %cst_52 = arith.constant dense<0.000000e+00> : vector<16xf32>
    %114 = vector.multi_reduction <add>, %113, %cst_52 [1] : vector<16x32xf32> to vector<16xf32>
    %115 = vector.shape_cast %114 : vector<16xf32> to vector<16x1xf32>
    %cst_53 = arith.constant 3.200000e+01 : f32
    %116 = vector.broadcast %cst_53 : f32 to vector<16x1xf32>
    %117 = arith.divf %115, %116 : vector<16x1xf32>
    %118 = vector.broadcast %117 : vector<16x1xf32> to vector<16x32xf32>
    %119 = arith.subf %113, %118 : vector<16x32xf32>
    %120 = arith.mulf %119, %119 : vector<16x32xf32>
    %cst_54 = arith.constant dense<0.000000e+00> : vector<16xf32>
    %121 = vector.multi_reduction <add>, %120, %cst_54 [1] : vector<16x32xf32> to vector<16xf32>
    %122 = vector.shape_cast %121 : vector<16xf32> to vector<16x1xf32>
    %cst_55 = arith.constant 3.200000e+01 : f32
    %123 = vector.broadcast %cst_55 : f32 to vector<16x1xf32>
    %124 = arith.divf %122, %123 : vector<16x1xf32>
    %125 = vector.broadcast %117 : vector<16x1xf32> to vector<16x32xf32>
    %126 = arith.subf %113, %125 : vector<16x32xf32>
    %cst_56 = arith.constant 9.99999974E-6 : f32
    %127 = vector.broadcast %cst_56 : f32 to vector<16x1xf32>
    %128 = arith.addf %124, %127 : vector<16x1xf32>
    %129 = math.rsqrt %128 : vector<16x1xf32>
    %130 = vector.broadcast %129 : vector<16x1xf32> to vector<16x32xf32>
    %131 = arith.mulf %126, %130 : vector<16x32xf32>
    %c0_57 = arith.constant 0 : index
    %c0_58 = arith.constant 0 : index
    %c0_59 = arith.constant 0 : index
    %132 = vector.load %arg7[%c0_57, %c0_58, %c0_59] : memref<2x1x32xf32, #tpu.memory_space<vmem>>, vector<1x1x32xf32>
    %133 = vector.shape_cast %132 : vector<1x1x32xf32> to vector<1x32xf32>
    %134 = vector.broadcast %133 : vector<1x32xf32> to vector<16x32xf32>
    %135 = arith.mulf %131, %134 : vector<16x32xf32>
    %c0_60 = arith.constant 0 : index
    %c0_61 = arith.constant 0 : index
    %c0_62 = arith.constant 0 : index
    %136 = vector.load %arg8[%c0_60, %c0_61, %c0_62] : memref<2x1x32xf32, #tpu.memory_space<vmem>>, vector<1x1x32xf32>
    %137 = vector.shape_cast %136 : vector<1x1x32xf32> to vector<1x32xf32>
    %138 = vector.broadcast %137 : vector<1x32xf32> to vector<16x32xf32>
    %139 = arith.addf %135, %138 : vector<16x32xf32>
    %140 = arith.mulf %139, %3 : vector<16x32xf32>
    %c0_63 = arith.constant 0 : index
    %c0_64 = arith.constant 0 : index
    %c0_65 = arith.constant 0 : index
    %141 = vector.load %arg9[%c0_63, %c0_64, %c0_65] : memref<2x32x64xf32, #tpu.memory_space<vmem>>, vector<1x32x64xf32>
    %142 = vector.shape_cast %141 : vector<1x32x64xf32> to vector<32x64xf32>
    %cst_66 = arith.constant dense<0.000000e+00> : vector<16x64xf32>
    %143 = tpu.matmul %140, %142, %cst_66 {dimension_numbers = #tpu.dot_dimension_numbers<[1], [0], [0], [1], [0, 0, 1, 1], [], []>} : vector<16x32xf32>, vector<32x64xf32>, vector<16x64xf32> -> vector<16x64xf32>
    %c0_67 = arith.constant 0 : index
    %c0_68 = arith.constant 0 : index
    %c0_69 = arith.constant 0 : index
    %144 = vector.load %arg10[%c0_67, %c0_68, %c0_69] : memref<2x1x64xf32, #tpu.memory_space<vmem>>, vector<1x1x64xf32>
    %145 = vector.shape_cast %144 : vector<1x1x64xf32> to vector<1x64xf32>
    %146 = vector.broadcast %145 : vector<1x64xf32> to vector<16x64xf32>
    %147 = arith.addf %143, %146 : vector<16x64xf32>
    %cst_70 = arith.constant 0.000000e+00 : f32
    %148 = vector.broadcast %cst_70 : f32 to vector<16x64xf32>
    %149 = arith.maximumf %147, %148 : vector<16x64xf32>
    %c0_71 = arith.constant 0 : index
    %c0_72 = arith.constant 0 : index
    %c0_73 = arith.constant 0 : index
    %150 = vector.load %arg11[%c0_71, %c0_72, %c0_73] : memref<2x64x32xf32, #tpu.memory_space<vmem>>, vector<1x64x32xf32>
    %151 = vector.shape_cast %150 : vector<1x64x32xf32> to vector<64x32xf32>
    %cst_74 = arith.constant dense<0.000000e+00> : vector<16x32xf32>
    %152 = tpu.matmul %149, %151, %cst_74 {dimension_numbers = #tpu.dot_dimension_numbers<[1], [0], [0], [1], [0, 0, 1, 1], [], []>} : vector<16x64xf32>, vector<64x32xf32>, vector<16x32xf32> -> vector<16x32xf32>
    %c0_75 = arith.constant 0 : index
    %c0_76 = arith.constant 0 : index
    %c0_77 = arith.constant 0 : index
    %153 = vector.load %arg12[%c0_75, %c0_76, %c0_77] : memref<2x1x32xf32, #tpu.memory_space<vmem>>, vector<1x1x32xf32>
    %154 = vector.shape_cast %153 : vector<1x1x32xf32> to vector<1x32xf32>
    %155 = vector.broadcast %154 : vector<1x32xf32> to vector<16x32xf32>
    %156 = arith.addf %152, %155 : vector<16x32xf32>
    %157 = arith.addf %156, %140 : vector<16x32xf32>
    %cst_78 = arith.constant dense<0.000000e+00> : vector<16xf32>
    %158 = vector.multi_reduction <add>, %157, %cst_78 [1] : vector<16x32xf32> to vector<16xf32>
    %159 = vector.shape_cast %158 : vector<16xf32> to vector<16x1xf32>
    %cst_79 = arith.constant 3.200000e+01 : f32
    %160 = vector.broadcast %cst_79 : f32 to vector<16x1xf32>
    %161 = arith.divf %159, %160 : vector<16x1xf32>
    %162 = vector.broadcast %161 : vector<16x1xf32> to vector<16x32xf32>
    %163 = arith.subf %157, %162 : vector<16x32xf32>
    %164 = arith.mulf %163, %163 : vector<16x32xf32>
    %cst_80 = arith.constant dense<0.000000e+00> : vector<16xf32>
    %165 = vector.multi_reduction <add>, %164, %cst_80 [1] : vector<16x32xf32> to vector<16xf32>
    %166 = vector.shape_cast %165 : vector<16xf32> to vector<16x1xf32>
    %cst_81 = arith.constant 3.200000e+01 : f32
    %167 = vector.broadcast %cst_81 : f32 to vector<16x1xf32>
    %168 = arith.divf %166, %167 : vector<16x1xf32>
    %169 = vector.broadcast %161 : vector<16x1xf32> to vector<16x32xf32>
    %170 = arith.subf %157, %169 : vector<16x32xf32>
    %cst_82 = arith.constant 9.99999974E-6 : f32
    %171 = vector.broadcast %cst_82 : f32 to vector<16x1xf32>
    %172 = arith.addf %168, %171 : vector<16x1xf32>
    %173 = math.rsqrt %172 : vector<16x1xf32>
    %174 = vector.broadcast %173 : vector<16x1xf32> to vector<16x32xf32>
    %175 = arith.mulf %170, %174 : vector<16x32xf32>
    %c0_83 = arith.constant 0 : index
    %c0_84 = arith.constant 0 : index
    %c0_85 = arith.constant 0 : index
    %176 = vector.load %arg13[%c0_83, %c0_84, %c0_85] : memref<2x1x32xf32, #tpu.memory_space<vmem>>, vector<1x1x32xf32>
    %177 = vector.shape_cast %176 : vector<1x1x32xf32> to vector<1x32xf32>
    %178 = vector.broadcast %177 : vector<1x32xf32> to vector<16x32xf32>
    %179 = arith.mulf %175, %178 : vector<16x32xf32>
    %c0_86 = arith.constant 0 : index
    %c0_87 = arith.constant 0 : index
    %c0_88 = arith.constant 0 : index
    %180 = vector.load %arg14[%c0_86, %c0_87, %c0_88] : memref<2x1x32xf32, #tpu.memory_space<vmem>>, vector<1x1x32xf32>
    %181 = vector.shape_cast %180 : vector<1x1x32xf32> to vector<1x32xf32>
    %182 = vector.broadcast %181 : vector<1x32xf32> to vector<16x32xf32>
    %183 = arith.addf %179, %182 : vector<16x32xf32>
    %184 = arith.mulf %183, %3 : vector<16x32xf32>
    %c1_89 = arith.constant 1 : index
    %c0_90 = arith.constant 0 : index
    %c0_91 = arith.constant 0 : index
    %185 = vector.load %arg3[%c1_89, %c0_90, %c0_91] : memref<2x32x96xf32, #tpu.memory_space<vmem>>, vector<1x32x96xf32>
    %186 = vector.shape_cast %185 : vector<1x32x96xf32> to vector<32x96xf32>
    %cst_92 = arith.constant dense<0.000000e+00> : vector<16x96xf32>
    %187 = tpu.matmul %184, %186, %cst_92 {dimension_numbers = #tpu.dot_dimension_numbers<[1], [0], [0], [1], [0, 0, 1, 1], [], []>} : vector<16x32xf32>, vector<32x96xf32>, vector<16x96xf32> -> vector<16x96xf32>
    %c1_93 = arith.constant 1 : index
    %c0_94 = arith.constant 0 : index
    %c0_95 = arith.constant 0 : index
    %188 = vector.load %arg4[%c1_93, %c0_94, %c0_95] : memref<2x1x96xf32, #tpu.memory_space<vmem>>, vector<1x1x96xf32>
    %189 = vector.shape_cast %188 : vector<1x1x96xf32> to vector<1x96xf32>
    %190 = vector.broadcast %189 : vector<1x96xf32> to vector<16x96xf32>
    %191 = arith.addf %187, %190 : vector<16x96xf32>
    %192 = vector.shape_cast %191 : vector<16x96xf32> to vector<2x8x96xf32>
    %c1_96 = arith.constant 1 : index
    %c0_97 = arith.constant 0 : index
    %c0_98 = arith.constant 0 : index
    %193 = vector.load %arg6[%c1_96, %c0_97, %c0_98] : memref<2x1x32xf32, #tpu.memory_space<vmem>>, vector<1x1x32xf32>
    %194 = vector.shape_cast %193 : vector<1x1x32xf32> to vector<1x32xf32>
    %195 = vector.broadcast %194 : vector<1x32xf32> to vector<16x32xf32>
    %196 = arith.addf %184, %195 : vector<16x32xf32>
    %197 = vector.extract_strided_slice %192 {offsets = [0, 0, 0], sizes = [2, 8, 8], strides = [1, 1, 1]} : vector<2x8x96xf32> to vector<2x8x8xf32>
    %198 = vector.extract_strided_slice %192 {offsets = [0, 0, 32], sizes = [2, 8, 8], strides = [1, 1, 1]} : vector<2x8x96xf32> to vector<2x8x8xf32>
    %199 = vector.extract_strided_slice %192 {offsets = [0, 0, 64], sizes = [2, 8, 8], strides = [1, 1, 1]} : vector<2x8x96xf32> to vector<2x8x8xf32>
    "tpu.trace_start"() <{level = 10 : i32, message = "bqd,bkd->bqk"}> : () -> ()
    %cst_99 = arith.constant dense<0.000000e+00> : vector<2x8x8xf32>
    %200 = tpu.matmul %197, %198, %cst_99 {dimension_numbers = #tpu.dot_dimension_numbers<[2], [2], [1], [1], [0, 0, 0, 1, 1, 1], [0], [0]>} : vector<2x8x8xf32>, vector<2x8x8xf32>, vector<2x8x8xf32> -> vector<2x8x8xf32>
    "tpu.trace_stop"() : () -> ()
    %201 = arith.addf %200, %9 : vector<2x8x8xf32>
    %cst_100 = arith.constant dense<0xFF800000> : vector<2x8xf32>
    %202 = vector.multi_reduction <maximumf>, %201, %cst_100 [2] : vector<2x8x8xf32> to vector<2x8xf32>
    %203 = vector.shape_cast %202 : vector<2x8xf32> to vector<2x8x1xf32>
    %204 = vector.broadcast %203 : vector<2x8x1xf32> to vector<2x8x8xf32>
    %205 = arith.subf %201, %204 : vector<2x8x8xf32>
    %206 = math.exp %205 : vector<2x8x8xf32>
    %cst_101 = arith.constant dense<0.000000e+00> : vector<2x8xf32>
    %207 = vector.multi_reduction <add>, %206, %cst_101 [2] : vector<2x8x8xf32> to vector<2x8xf32>
    %208 = vector.shape_cast %207 : vector<2x8xf32> to vector<2x8x1xf32>
    %cst_102 = arith.constant 9.99999997E-7 : f32
    %209 = vector.broadcast %cst_102 : f32 to vector<2x8x1xf32>
    %210 = arith.maximumf %208, %209 : vector<2x8x1xf32>
    %211 = tpu.reciprocal %210 {approx = true} : vector<2x8x1xf32> -> vector<2x8x1xf32>
    %212 = vector.broadcast %211 : vector<2x8x1xf32> to vector<2x8x8xf32>
    %213 = arith.mulf %206, %212 : vector<2x8x8xf32>
    "tpu.trace_start"() <{level = 10 : i32, message = "bqk,bkd->bqd"}> : () -> ()
    %cst_103 = arith.constant dense<0.000000e+00> : vector<2x8x8xf32>
    %214 = tpu.matmul %213, %199, %cst_103 {dimension_numbers = #tpu.dot_dimension_numbers<[2], [1], [1], [2], [0, 0, 0, 1, 1, 2], [0], [0]>} : vector<2x8x8xf32>, vector<2x8x8xf32>, vector<2x8x8xf32> -> vector<2x8x8xf32>
    "tpu.trace_stop"() : () -> ()
    %215 = vector.shape_cast %214 : vector<2x8x8xf32> to vector<16x8xf32>
    %c1_104 = arith.constant 1 : index
    %c0_105 = arith.constant 0 : index
    %c0_106 = arith.constant 0 : index
    %c0_107 = arith.constant 0 : index
    %216 = vector.load %arg5[%c1_104, %c0_105, %c0_106, %c0_107] : memref<2x4x8x32xf32, #tpu.memory_space<vmem>>, vector<1x1x8x32xf32>
    %217 = vector.shape_cast %216 : vector<1x1x8x32xf32> to vector<8x32xf32>
    %cst_108 = arith.constant dense<0.000000e+00> : vector<16x32xf32>
    %218 = tpu.matmul %215, %217, %cst_108 {dimension_numbers = #tpu.dot_dimension_numbers<[1], [0], [0], [1], [0, 0, 1, 1], [], []>} : vector<16x8xf32>, vector<8x32xf32>, vector<16x32xf32> -> vector<16x32xf32>
    %219 = arith.addf %196, %218 : vector<16x32xf32>
    %220 = vector.extract_strided_slice %192 {offsets = [0, 0, 8], sizes = [2, 8, 8], strides = [1, 1, 1]} : vector<2x8x96xf32> to vector<2x8x8xf32>
    %221 = vector.extract_strided_slice %192 {offsets = [0, 0, 40], sizes = [2, 8, 8], strides = [1, 1, 1]} : vector<2x8x96xf32> to vector<2x8x8xf32>
    %222 = vector.extract_strided_slice %192 {offsets = [0, 0, 72], sizes = [2, 8, 8], strides = [1, 1, 1]} : vector<2x8x96xf32> to vector<2x8x8xf32>
    "tpu.trace_start"() <{level = 10 : i32, message = "bqd,bkd->bqk"}> : () -> ()
    %cst_109 = arith.constant dense<0.000000e+00> : vector<2x8x8xf32>
    %223 = tpu.matmul %220, %221, %cst_109 {dimension_numbers = #tpu.dot_dimension_numbers<[2], [2], [1], [1], [0, 0, 0, 1, 1, 1], [0], [0]>} : vector<2x8x8xf32>, vector<2x8x8xf32>, vector<2x8x8xf32> -> vector<2x8x8xf32>
    "tpu.trace_stop"() : () -> ()
    %224 = arith.addf %223, %9 : vector<2x8x8xf32>
    %cst_110 = arith.constant dense<0xFF800000> : vector<2x8xf32>
    %225 = vector.multi_reduction <maximumf>, %224, %cst_110 [2] : vector<2x8x8xf32> to vector<2x8xf32>
    %226 = vector.shape_cast %225 : vector<2x8xf32> to vector<2x8x1xf32>
    %227 = vector.broadcast %226 : vector<2x8x1xf32> to vector<2x8x8xf32>
    %228 = arith.subf %224, %227 : vector<2x8x8xf32>
    %229 = math.exp %228 : vector<2x8x8xf32>
    %cst_111 = arith.constant dense<0.000000e+00> : vector<2x8xf32>
    %230 = vector.multi_reduction <add>, %229, %cst_111 [2] : vector<2x8x8xf32> to vector<2x8xf32>
    %231 = vector.shape_cast %230 : vector<2x8xf32> to vector<2x8x1xf32>
    %cst_112 = arith.constant 9.99999997E-7 : f32
    %232 = vector.broadcast %cst_112 : f32 to vector<2x8x1xf32>
    %233 = arith.maximumf %231, %232 : vector<2x8x1xf32>
    %234 = tpu.reciprocal %233 {approx = true} : vector<2x8x1xf32> -> vector<2x8x1xf32>
    %235 = vector.broadcast %234 : vector<2x8x1xf32> to vector<2x8x8xf32>
    %236 = arith.mulf %229, %235 : vector<2x8x8xf32>
    "tpu.trace_start"() <{level = 10 : i32, message = "bqk,bkd->bqd"}> : () -> ()
    %cst_113 = arith.constant dense<0.000000e+00> : vector<2x8x8xf32>
    %237 = tpu.matmul %236, %222, %cst_113 {dimension_numbers = #tpu.dot_dimension_numbers<[2], [1], [1], [2], [0, 0, 0, 1, 1, 2], [0], [0]>} : vector<2x8x8xf32>, vector<2x8x8xf32>, vector<2x8x8xf32> -> vector<2x8x8xf32>
    "tpu.trace_stop"() : () -> ()
    %238 = vector.shape_cast %237 : vector<2x8x8xf32> to vector<16x8xf32>
    %c1_114 = arith.constant 1 : index
    %c1_115 = arith.constant 1 : index
    %c0_116 = arith.constant 0 : index
    %c0_117 = arith.constant 0 : index
    %239 = vector.load %arg5[%c1_114, %c1_115, %c0_116, %c0_117] : memref<2x4x8x32xf32, #tpu.memory_space<vmem>>, vector<1x1x8x32xf32>
    %240 = vector.shape_cast %239 : vector<1x1x8x32xf32> to vector<8x32xf32>
    %cst_118 = arith.constant dense<0.000000e+00> : vector<16x32xf32>
    %241 = tpu.matmul %238, %240, %cst_118 {dimension_numbers = #tpu.dot_dimension_numbers<[1], [0], [0], [1], [0, 0, 1, 1], [], []>} : vector<16x8xf32>, vector<8x32xf32>, vector<16x32xf32> -> vector<16x32xf32>
    %242 = arith.addf %219, %241 : vector<16x32xf32>
    %243 = vector.extract_strided_slice %192 {offsets = [0, 0, 16], sizes = [2, 8, 8], strides = [1, 1, 1]} : vector<2x8x96xf32> to vector<2x8x8xf32>
    %244 = vector.extract_strided_slice %192 {offsets = [0, 0, 48], sizes = [2, 8, 8], strides = [1, 1, 1]} : vector<2x8x96xf32> to vector<2x8x8xf32>
    %245 = vector.extract_strided_slice %192 {offsets = [0, 0, 80], sizes = [2, 8, 8], strides = [1, 1, 1]} : vector<2x8x96xf32> to vector<2x8x8xf32>
    "tpu.trace_start"() <{level = 10 : i32, message = "bqd,bkd->bqk"}> : () -> ()
    %cst_119 = arith.constant dense<0.000000e+00> : vector<2x8x8xf32>
    %246 = tpu.matmul %243, %244, %cst_119 {dimension_numbers = #tpu.dot_dimension_numbers<[2], [2], [1], [1], [0, 0, 0, 1, 1, 1], [0], [0]>} : vector<2x8x8xf32>, vector<2x8x8xf32>, vector<2x8x8xf32> -> vector<2x8x8xf32>
    "tpu.trace_stop"() : () -> ()
    %247 = arith.addf %246, %9 : vector<2x8x8xf32>
    %cst_120 = arith.constant dense<0xFF800000> : vector<2x8xf32>
    %248 = vector.multi_reduction <maximumf>, %247, %cst_120 [2] : vector<2x8x8xf32> to vector<2x8xf32>
    %249 = vector.shape_cast %248 : vector<2x8xf32> to vector<2x8x1xf32>
    %250 = vector.broadcast %249 : vector<2x8x1xf32> to vector<2x8x8xf32>
    %251 = arith.subf %247, %250 : vector<2x8x8xf32>
    %252 = math.exp %251 : vector<2x8x8xf32>
    %cst_121 = arith.constant dense<0.000000e+00> : vector<2x8xf32>
    %253 = vector.multi_reduction <add>, %252, %cst_121 [2] : vector<2x8x8xf32> to vector<2x8xf32>
    %254 = vector.shape_cast %253 : vector<2x8xf32> to vector<2x8x1xf32>
    %cst_122 = arith.constant 9.99999997E-7 : f32
    %255 = vector.broadcast %cst_122 : f32 to vector<2x8x1xf32>
    %256 = arith.maximumf %254, %255 : vector<2x8x1xf32>
    %257 = tpu.reciprocal %256 {approx = true} : vector<2x8x1xf32> -> vector<2x8x1xf32>
    %258 = vector.broadcast %257 : vector<2x8x1xf32> to vector<2x8x8xf32>
    %259 = arith.mulf %252, %258 : vector<2x8x8xf32>
    "tpu.trace_start"() <{level = 10 : i32, message = "bqk,bkd->bqd"}> : () -> ()
    %cst_123 = arith.constant dense<0.000000e+00> : vector<2x8x8xf32>
    %260 = tpu.matmul %259, %245, %cst_123 {dimension_numbers = #tpu.dot_dimension_numbers<[2], [1], [1], [2], [0, 0, 0, 1, 1, 2], [0], [0]>} : vector<2x8x8xf32>, vector<2x8x8xf32>, vector<2x8x8xf32> -> vector<2x8x8xf32>
    "tpu.trace_stop"() : () -> ()
    %261 = vector.shape_cast %260 : vector<2x8x8xf32> to vector<16x8xf32>
    %c1_124 = arith.constant 1 : index
    %c2_125 = arith.constant 2 : index
    %c0_126 = arith.constant 0 : index
    %c0_127 = arith.constant 0 : index
    %262 = vector.load %arg5[%c1_124, %c2_125, %c0_126, %c0_127] : memref<2x4x8x32xf32, #tpu.memory_space<vmem>>, vector<1x1x8x32xf32>
    %263 = vector.shape_cast %262 : vector<1x1x8x32xf32> to vector<8x32xf32>
    %cst_128 = arith.constant dense<0.000000e+00> : vector<16x32xf32>
    %264 = tpu.matmul %261, %263, %cst_128 {dimension_numbers = #tpu.dot_dimension_numbers<[1], [0], [0], [1], [0, 0, 1, 1], [], []>} : vector<16x8xf32>, vector<8x32xf32>, vector<16x32xf32> -> vector<16x32xf32>
    %265 = arith.addf %242, %264 : vector<16x32xf32>
    %266 = vector.extract_strided_slice %192 {offsets = [0, 0, 24], sizes = [2, 8, 8], strides = [1, 1, 1]} : vector<2x8x96xf32> to vector<2x8x8xf32>
    %267 = vector.extract_strided_slice %192 {offsets = [0, 0, 56], sizes = [2, 8, 8], strides = [1, 1, 1]} : vector<2x8x96xf32> to vector<2x8x8xf32>
    %268 = vector.extract_strided_slice %192 {offsets = [0, 0, 88], sizes = [2, 8, 8], strides = [1, 1, 1]} : vector<2x8x96xf32> to vector<2x8x8xf32>
    "tpu.trace_start"() <{level = 10 : i32, message = "bqd,bkd->bqk"}> : () -> ()
    %cst_129 = arith.constant dense<0.000000e+00> : vector<2x8x8xf32>
    %269 = tpu.matmul %266, %267, %cst_129 {dimension_numbers = #tpu.dot_dimension_numbers<[2], [2], [1], [1], [0, 0, 0, 1, 1, 1], [0], [0]>} : vector<2x8x8xf32>, vector<2x8x8xf32>, vector<2x8x8xf32> -> vector<2x8x8xf32>
    "tpu.trace_stop"() : () -> ()
    %270 = arith.addf %269, %9 : vector<2x8x8xf32>
    %cst_130 = arith.constant dense<0xFF800000> : vector<2x8xf32>
    %271 = vector.multi_reduction <maximumf>, %270, %cst_130 [2] : vector<2x8x8xf32> to vector<2x8xf32>
    %272 = vector.shape_cast %271 : vector<2x8xf32> to vector<2x8x1xf32>
    %273 = vector.broadcast %272 : vector<2x8x1xf32> to vector<2x8x8xf32>
    %274 = arith.subf %270, %273 : vector<2x8x8xf32>
    %275 = math.exp %274 : vector<2x8x8xf32>
    %cst_131 = arith.constant dense<0.000000e+00> : vector<2x8xf32>
    %276 = vector.multi_reduction <add>, %275, %cst_131 [2] : vector<2x8x8xf32> to vector<2x8xf32>
    %277 = vector.shape_cast %276 : vector<2x8xf32> to vector<2x8x1xf32>
    %cst_132 = arith.constant 9.99999997E-7 : f32
    %278 = vector.broadcast %cst_132 : f32 to vector<2x8x1xf32>
    %279 = arith.maximumf %277, %278 : vector<2x8x1xf32>
    %280 = tpu.reciprocal %279 {approx = true} : vector<2x8x1xf32> -> vector<2x8x1xf32>
    %281 = vector.broadcast %280 : vector<2x8x1xf32> to vector<2x8x8xf32>
    %282 = arith.mulf %275, %281 : vector<2x8x8xf32>
    "tpu.trace_start"() <{level = 10 : i32, message = "bqk,bkd->bqd"}> : () -> ()
    %cst_133 = arith.constant dense<0.000000e+00> : vector<2x8x8xf32>
    %283 = tpu.matmul %282, %268, %cst_133 {dimension_numbers = #tpu.dot_dimension_numbers<[2], [1], [1], [2], [0, 0, 0, 1, 1, 2], [0], [0]>} : vector<2x8x8xf32>, vector<2x8x8xf32>, vector<2x8x8xf32> -> vector<2x8x8xf32>
    "tpu.trace_stop"() : () -> ()
    %284 = vector.shape_cast %283 : vector<2x8x8xf32> to vector<16x8xf32>
    %c1_134 = arith.constant 1 : index
    %c3_135 = arith.constant 3 : index
    %c0_136 = arith.constant 0 : index
    %c0_137 = arith.constant 0 : index
    %285 = vector.load %arg5[%c1_134, %c3_135, %c0_136, %c0_137] : memref<2x4x8x32xf32, #tpu.memory_space<vmem>>, vector<1x1x8x32xf32>
    %286 = vector.shape_cast %285 : vector<1x1x8x32xf32> to vector<8x32xf32>
    %cst_138 = arith.constant dense<0.000000e+00> : vector<16x32xf32>
    %287 = tpu.matmul %284, %286, %cst_138 {dimension_numbers = #tpu.dot_dimension_numbers<[1], [0], [0], [1], [0, 0, 1, 1], [], []>} : vector<16x8xf32>, vector<8x32xf32>, vector<16x32xf32> -> vector<16x32xf32>
    %288 = arith.addf %265, %287 : vector<16x32xf32>
    %cst_139 = arith.constant dense<0.000000e+00> : vector<16xf32>
    %289 = vector.multi_reduction <add>, %288, %cst_139 [1] : vector<16x32xf32> to vector<16xf32>
    %290 = vector.shape_cast %289 : vector<16xf32> to vector<16x1xf32>
    %cst_140 = arith.constant 3.200000e+01 : f32
    %291 = vector.broadcast %cst_140 : f32 to vector<16x1xf32>
    %292 = arith.divf %290, %291 : vector<16x1xf32>
    %293 = vector.broadcast %292 : vector<16x1xf32> to vector<16x32xf32>
    %294 = arith.subf %288, %293 : vector<16x32xf32>
    %295 = arith.mulf %294, %294 : vector<16x32xf32>
    %cst_141 = arith.constant dense<0.000000e+00> : vector<16xf32>
    %296 = vector.multi_reduction <add>, %295, %cst_141 [1] : vector<16x32xf32> to vector<16xf32>
    %297 = vector.shape_cast %296 : vector<16xf32> to vector<16x1xf32>
    %cst_142 = arith.constant 3.200000e+01 : f32
    %298 = vector.broadcast %cst_142 : f32 to vector<16x1xf32>
    %299 = arith.divf %297, %298 : vector<16x1xf32>
    %300 = vector.broadcast %292 : vector<16x1xf32> to vector<16x32xf32>
    %301 = arith.subf %288, %300 : vector<16x32xf32>
    %cst_143 = arith.constant 9.99999974E-6 : f32
    %302 = vector.broadcast %cst_143 : f32 to vector<16x1xf32>
    %303 = arith.addf %299, %302 : vector<16x1xf32>
    %304 = math.rsqrt %303 : vector<16x1xf32>
    %305 = vector.broadcast %304 : vector<16x1xf32> to vector<16x32xf32>
    %306 = arith.mulf %301, %305 : vector<16x32xf32>
    %c1_144 = arith.constant 1 : index
    %c0_145 = arith.constant 0 : index
    %c0_146 = arith.constant 0 : index
    %307 = vector.load %arg7[%c1_144, %c0_145, %c0_146] : memref<2x1x32xf32, #tpu.memory_space<vmem>>, vector<1x1x32xf32>
    %308 = vector.shape_cast %307 : vector<1x1x32xf32> to vector<1x32xf32>
    %309 = vector.broadcast %308 : vector<1x32xf32> to vector<16x32xf32>
    %310 = arith.mulf %306, %309 : vector<16x32xf32>
    %c1_147 = arith.constant 1 : index
    %c0_148 = arith.constant 0 : index
    %c0_149 = arith.constant 0 : index
    %311 = vector.load %arg8[%c1_147, %c0_148, %c0_149] : memref<2x1x32xf32, #tpu.memory_space<vmem>>, vector<1x1x32xf32>
    %312 = vector.shape_cast %311 : vector<1x1x32xf32> to vector<1x32xf32>
    %313 = vector.broadcast %312 : vector<1x32xf32> to vector<16x32xf32>
    %314 = arith.addf %310, %313 : vector<16x32xf32>
    %315 = arith.mulf %314, %3 : vector<16x32xf32>
    %c1_150 = arith.constant 1 : index
    %c0_151 = arith.constant 0 : index
    %c0_152 = arith.constant 0 : index
    %316 = vector.load %arg9[%c1_150, %c0_151, %c0_152] : memref<2x32x64xf32, #tpu.memory_space<vmem>>, vector<1x32x64xf32>
    %317 = vector.shape_cast %316 : vector<1x32x64xf32> to vector<32x64xf32>
    %cst_153 = arith.constant dense<0.000000e+00> : vector<16x64xf32>
    %318 = tpu.matmul %315, %317, %cst_153 {dimension_numbers = #tpu.dot_dimension_numbers<[1], [0], [0], [1], [0, 0, 1, 1], [], []>} : vector<16x32xf32>, vector<32x64xf32>, vector<16x64xf32> -> vector<16x64xf32>
    %c1_154 = arith.constant 1 : index
    %c0_155 = arith.constant 0 : index
    %c0_156 = arith.constant 0 : index
    %319 = vector.load %arg10[%c1_154, %c0_155, %c0_156] : memref<2x1x64xf32, #tpu.memory_space<vmem>>, vector<1x1x64xf32>
    %320 = vector.shape_cast %319 : vector<1x1x64xf32> to vector<1x64xf32>
    %321 = vector.broadcast %320 : vector<1x64xf32> to vector<16x64xf32>
    %322 = arith.addf %318, %321 : vector<16x64xf32>
    %cst_157 = arith.constant 0.000000e+00 : f32
    %323 = vector.broadcast %cst_157 : f32 to vector<16x64xf32>
    %324 = arith.maximumf %322, %323 : vector<16x64xf32>
    %c1_158 = arith.constant 1 : index
    %c0_159 = arith.constant 0 : index
    %c0_160 = arith.constant 0 : index
    %325 = vector.load %arg11[%c1_158, %c0_159, %c0_160] : memref<2x64x32xf32, #tpu.memory_space<vmem>>, vector<1x64x32xf32>
    %326 = vector.shape_cast %325 : vector<1x64x32xf32> to vector<64x32xf32>
    %cst_161 = arith.constant dense<0.000000e+00> : vector<16x32xf32>
    %327 = tpu.matmul %324, %326, %cst_161 {dimension_numbers = #tpu.dot_dimension_numbers<[1], [0], [0], [1], [0, 0, 1, 1], [], []>} : vector<16x64xf32>, vector<64x32xf32>, vector<16x32xf32> -> vector<16x32xf32>
    %c1_162 = arith.constant 1 : index
    %c0_163 = arith.constant 0 : index
    %c0_164 = arith.constant 0 : index
    %328 = vector.load %arg12[%c1_162, %c0_163, %c0_164] : memref<2x1x32xf32, #tpu.memory_space<vmem>>, vector<1x1x32xf32>
    %329 = vector.shape_cast %328 : vector<1x1x32xf32> to vector<1x32xf32>
    %330 = vector.broadcast %329 : vector<1x32xf32> to vector<16x32xf32>
    %331 = arith.addf %327, %330 : vector<16x32xf32>
    %332 = arith.addf %331, %315 : vector<16x32xf32>
    %cst_165 = arith.constant dense<0.000000e+00> : vector<16xf32>
    %333 = vector.multi_reduction <add>, %332, %cst_165 [1] : vector<16x32xf32> to vector<16xf32>
    %334 = vector.shape_cast %333 : vector<16xf32> to vector<16x1xf32>
    %cst_166 = arith.constant 3.200000e+01 : f32
    %335 = vector.broadcast %cst_166 : f32 to vector<16x1xf32>
    %336 = arith.divf %334, %335 : vector<16x1xf32>
    %337 = vector.broadcast %336 : vector<16x1xf32> to vector<16x32xf32>
    %338 = arith.subf %332, %337 : vector<16x32xf32>
    %339 = arith.mulf %338, %338 : vector<16x32xf32>
    %cst_167 = arith.constant dense<0.000000e+00> : vector<16xf32>
    %340 = vector.multi_reduction <add>, %339, %cst_167 [1] : vector<16x32xf32> to vector<16xf32>
    %341 = vector.shape_cast %340 : vector<16xf32> to vector<16x1xf32>
    %cst_168 = arith.constant 3.200000e+01 : f32
    %342 = vector.broadcast %cst_168 : f32 to vector<16x1xf32>
    %343 = arith.divf %341, %342 : vector<16x1xf32>
    %344 = vector.broadcast %336 : vector<16x1xf32> to vector<16x32xf32>
    %345 = arith.subf %332, %344 : vector<16x32xf32>
    %cst_169 = arith.constant 9.99999974E-6 : f32
    %346 = vector.broadcast %cst_169 : f32 to vector<16x1xf32>
    %347 = arith.addf %343, %346 : vector<16x1xf32>
    %348 = math.rsqrt %347 : vector<16x1xf32>
    %349 = vector.broadcast %348 : vector<16x1xf32> to vector<16x32xf32>
    %350 = arith.mulf %345, %349 : vector<16x32xf32>
    %c1_170 = arith.constant 1 : index
    %c0_171 = arith.constant 0 : index
    %c0_172 = arith.constant 0 : index
    %351 = vector.load %arg13[%c1_170, %c0_171, %c0_172] : memref<2x1x32xf32, #tpu.memory_space<vmem>>, vector<1x1x32xf32>
    %352 = vector.shape_cast %351 : vector<1x1x32xf32> to vector<1x32xf32>
    %353 = vector.broadcast %352 : vector<1x32xf32> to vector<16x32xf32>
    %354 = arith.mulf %350, %353 : vector<16x32xf32>
    %c1_173 = arith.constant 1 : index
    %c0_174 = arith.constant 0 : index
    %c0_175 = arith.constant 0 : index
    %355 = vector.load %arg14[%c1_173, %c0_174, %c0_175] : memref<2x1x32xf32, #tpu.memory_space<vmem>>, vector<1x1x32xf32>
    %356 = vector.shape_cast %355 : vector<1x1x32xf32> to vector<1x32xf32>
    %357 = vector.broadcast %356 : vector<1x32xf32> to vector<16x32xf32>
    %358 = arith.addf %354, %357 : vector<16x32xf32>
    %359 = arith.mulf %358, %3 : vector<16x32xf32>
    %c0_176 = arith.constant 0 : index
    %c0_177 = arith.constant 0 : index
    %360 = vector.load %arg15[%c0_176, %c0_177] : memref<16x32xf32, #tpu.memory_space<vmem>>, vector<16x32xf32>
    tpu.vector_store %arg15[%c0_176, %c0_177], %359 {strides = array<i32>} : memref<16x32xf32, #tpu.memory_space<vmem>>, vector<16x32xf32>,
    return
  }
}

</mosaic_0001>

<bundles_post_ra>
// kernel: tpu_custom_call.1
= control target key start
LH: loop header
LB: loop body
LE: loop exit
PB: predicated region body
PF: predicated region fallthrough
CT: control target
= control target key end

     0   :  { %20 = vsyncpa [#allocation3], 0  ;;  %s5612_s0 = inlined_call_operand.vmem [shape: f32[16,32], index: 0, kind: input, shape index: {}]   ;;  %s5613_s1 = inlined_call_operand.hbm [shape: f32[2,8], index: 1, kind: input, shape index: {}]   ;;  %s5614_s2 = inlined_call_operand.vmem [shape: f32[16,1], index: 2, kind: input, shape index: {}]   ;;  %s5615_s3 = inlined_call_operand.vmem [shape: f32[2,32,96], index: 3, kind: input, shape index: {}]   ;;  %s5616_s4 = inlined_call_operand.vmem [shape: f32[2,1,96], index: 4, kind: input, shape index: {}]   ;;  %s5617_s5 = inlined_call_operand.vmem [shape: f32[2,4,8,32], index: 5, kind: input, shape index: {}]   ;;  %s5618_s6 = inlined_call_operand.vmem [shape: f32[2,1,32], index: 6, kind: input, shape index: {}]   ;;  %s5619_s7 = inlined_call_operand.vmem [shape: f32[2,1,32], index: 7, kind: input, shape index: {}]   ;;  %s5620_s8 = inlined_call_operand.vmem [shape: f32[2,1,32], index: 8, kind: input, shape index: {}]   ;;  %s5621_s9 = inlined_call_operand.vmem [shape: f32[2,32,64], index: 9, kind: input, shape index: {}]   ;;  %s5622_s10 = inlined_call_operand.vmem [shape: f32[2,1,64], index: 10, kind: input, shape index: {}]   ;;  %s5623_s11 = inlined_call_operand.vmem [shape: f32[2,64,32], index: 11, kind: input, shape index: {}]   ;;  %s5624_s12 = inlined_call_operand.vmem [shape: f32[2,1,32], index: 12, kind: input, shape index: {}]   ;;  %s5625_s13 = inlined_call_operand.vmem [shape: f32[2,1,32], index: 13, kind: input, shape index: {}]   ;;  %s5626_s14 = inlined_call_operand.vmem [shape: f32[2,1,32], index: 14, kind: input, shape index: {}]   ;;  %s5627_s15 = inlined_call_operand.hbm [shape: f32[16,32], index: 15, kind: output, shape index: {}]  }
   0x1   :  { %21 = vsyncpa [#allocation4], 0  ;;  %s4929_s18 = smov [#allocation2]  }
   0x2   :  { %s30_s19 = sshll.u32 %s4929_s18, 4  ;;  %s31_s19 = int_to_ptr.vmem [resolvable:$true] %s30_s19 }
   0x3   :  { %s4893_s20 = scalar_lea.vmem %s31_s19, 32  ;;  %p4898_p1 = scmp.lt.s32.totalorder %s31_s19, %s31_s19 }
   0x4   :  { %p4894_p0 = scmp.ne.s32.totalorder %s31_s19, %s4893_s20  ;;  %p4899_p2 = scmp.lt.s32.totalorder %s4893_s20, %s4893_s20 }
   0x6   :  { %p4900_p3 = por %p4899_p2, %p4898_p1 }
   0x8   :  { %p4901_p4 = pnand %p4900_p3, %p4894_p0 }
   0xa   :  { %4904 = shalt.err (!%p4901_p4)
}
   0xb   :  { %33 = dma.hbm_to_vmem [thread:$0]  %s5613_s1, 32, %s31_s19, [#allocation3]  }
   0xc   :  { %4925 = dma.done.wait [#allocation3], 32  }
   0xd   :  { %4926 = vsyncadd [#allocation3], 4294967264  ;;  %vm123_vm0 = vcmask 261120   ;;  %v115_v0 = vld [vmem:[%s5615_s3 + $0x18] sm:$0xff]  ;;  %v114_v1 = vld [vmem:[%s5615_s3 + $0x10] sm:$0xff]  ;;  %v4930_v6 = vmov 0.0   ;;  %v83_v16 = vlaneseq }
   0xe   :  { %4502 = vmatprep.subr.mxu0 %v115_v0  ;;  %v5040_v2 = vld [vmem:[%s5612_s0] sm:$0xff]  ;;  %v113_v3 = vld [vmem:[%s5615_s3 + $0x8] sm:$0xff]  ;;  %4518 = vmatprep.subr.mxu1 %v4930_v6  ;;  %vm4931_vm1 = vmmov 0   ;;  %s4932_s20 = smov 96   ;;  %vm217_vm2 = vcmask 64512   ;;  %s4934_s21 = smov 64  }
   0xf   :  { %4503 = vmatpush3.msra.mxu0 %v115_v0  ;;  %4510 = vmatprep.mubr.msk.f32.mxu0 %vm123_vm0, %v5040_v2  ;;  %v112_v4 = vld [vmem:[%s5615_s3] sm:$0xff]  ;;  %v5053_v5 = vld [vmem:[%s5612_s0 + $0x8] sm:$0xff]  ;;  %v4933_v14 = vmov 1966171168   ;;  %v84_v18 = vshrl.u32 %v83_v16, 7  ;;  %s4935_s22 = smov 120  }
  0x10   :  { %4504 = vmatprep.subr.mxu0 %v114_v1  ;;  %4520 = vmatprep.mubr.msk.f32.mxu1 %vm4931_vm1, %v4930_v6  ;;  %v4247_v8 = vld [vmem:[%s5616_s4] ss:$0 sm:$0xff]  ;;  %v81_v15 = vunpack.c.l.s4 %v4933_v14  ;;  %s4936_s23 = smov 88   ;;  %s4937_s28 = smov 56   ;;  %vm2036_vm3 = vcmask 523264  }
  0x11   :  { %4505 = vmatpush3.msra.mxu0 %v114_v1  ;;  %v77_v19 = vld [vmem:[#allocation2] sm:$0x3]  ;;  %v104_v24 = vsub.s32 0, %v84_v18  ;;  %s4938_s29 = smov 112   ;;  %s4939_s1 = smov 80  }
  0x12   :  { %4506 = vmatprep.subr.mxu0 %v113_v3  ;;  %v82_v17 = vunpack.c.0.s8 %v81_v15  ;;  %v78_v20 = vmul.f32 -1e+09, %v77_v19  ;;  %v545_v59 = vld [vmem:[%s5617_s5] sm:$0xff]  ;;  %s4940_s17 = smov 48   ;;  %s4941_s18 = smov 72  }
  0x13   :  { %4507 = vmatpush3.msra.mxu0 %v113_v3  ;;  %v5137_v16 = vld [vmem:[%s5618_s6] ss:$0 sm:$0xff]  ;;  %s5630_s0 = smov 104   ;;  %s5628_s25 = smov 40  }
  0x14   :  { %4508 = vmatprep.subr.mxu0 %v112_v4  ;;  %v85_v21 = vsub.s32 %v82_v17, %v84_v18  ;;  %v212_v17 = vadd.f32 %v5137_v16, %v5040_v2  ;;  %s4945_s24 = smov [#allocation5]  }
  0x15   :  { %4509 = vmatpush3.msra.mxu0 %v112_v4  ;;  %s4235_s26 = sshll.u32 %s4945_s24, 4  ;;  %s4236_s26 = int_to_ptr.vmem [resolvable:$true] %s4235_s26 }
  0x16   :  { %4511 = vmatmul.mubr.msk.f32.vlgmr.msra.gmra.mxu0 %vm123_vm0, %v5053_v5  ;;  %4513 = vmatprep.subr.mxu0 %v4930_v6  ;;  %v86_v22 = vrot.slane %v78_v20, %v85_v21  ;;  %p4910_p6 = scmp.lt.s32.totalorder %s4236_s26, %s4236_s26 }
  0x17   :  { %4515 = vmatprep.mubr.msk.f32.mxu0 %vm4931_vm1, %v4930_v6 }
  0x18   :  { %v94_v23 = vrot.slane %v86_v22, %v85_v21  ;;  %v87_v25 = vcombine.high %v86_v22, %v86_v22 }
  0x1a   :  { %v5086_v26 = vrot.slane %v94_v23, %v104_v24  ;;  %v101_v27 = vrot.slane %v87_v25, %v85_v21 }
  0x1c   :  { %v5089_v30 = vrot.slane %v101_v27, %v104_v24 }
  0xd6   :  { %v4512_v7 = vpop.f32.mrf.mxu0 }
  0xd7   :  { %v5070_v11 = vadd.f32 %v4512_v7, %v4247_v8 }
  0xd8   :  { %v196_v9 = vpop.f32.mrf.mxu0 }
  0xd9   :  { %v5066_v10 = vadd.f32 %v4247_v8, %v196_v9 }
  0xdb   :  { %215 = vrot.lane.b32.xlu0 %v5066_v10, %s4932_s20 }
  0xdf   :  { %293 = vrot.lane.b32.xlu0 %v5070_v11, %s4932_s20 }
 0x14d   :  { %v216_v12 = vpop.permute.xlu0 %215 }
 0x14e   :  { %4514 = vmatpush3.xpose.msk.msra.mxu0 %vm217_vm2, %v216_v12 }
 0x14f   :  { %4523 = vmatprep.subr.mxu0 %v4930_v6 }
 0x151   :  { %4516 = vmatmul.mubr.msk.f32.vlgmr.msra.gmra.mxu0 %vm217_vm2, %v5066_v10  ;;  %v294_v13 = vpop.permute.xlu0 %293 }
 0x152   :  { %4519 = vmatpush3.xpose.msk.msra.mxu1 %vm217_vm2, %v294_v13  ;;  %4525 = vmatprep.mubr.msk.f32.mxu0 %vm4931_vm1, %v4930_v6 }
 0x153   :  { %4528 = vmatprep.subr.mxu1 %v4930_v6 }
 0x155   :  { %4521 = vmatmul.mubr.msk.f32.vlgmr.msra.gmra.mxu1 %vm217_vm2, %v5070_v11 }
 0x156   :  { %4530 = vmatprep.mubr.msk.f32.mxu1 %vm4931_vm1, %v4930_v6 }
 0x211   :  { %v288_v28 = vpop.f32.mrf.mxu0 }
 0x212   :  { %v289_v29 = vadd.f32 %v288_v28, %v5086_v26 }
 0x213   :  { %v4517_v31 = vpop.f32.mrf.mxu0 }
 0x214   :  { %v369_v32 = vsel %vm217_vm2, %v289_v29, -inf }
 0x215   :  { %370 = vmax.xlane.f32.xlu1 %v369_v32  ;;  %v365_v33 = vpop.f32.mrf.mxu1 }
 0x216   :  { %v366_v34 = vadd.f32 %v365_v33, %v5089_v30 }
 0x217   :  { %v4522_v35 = vpop.f32.mrf.mxu1 }
 0x218   :  { %v372_v36 = vsel %vm217_vm2, %v366_v34, -inf }
 0x219   :  { %373 = vmax.xlane.f32.xlu1 %v372_v36 }
 0x29e   :  { %v371_v37 = vpop.xlane.xlu1 %370 }
 0x29f   :  { %v375_v38 = vsub.f32 %v289_v29, %v371_v37 }
 0x2a1   :  { %v377_v39 = vmul.f32 1.442695, %v375_v38 }
 0x2a2   :  { %v374_v40 = vpop.xlane.xlu1 %373 }
 0x2a3   :  { %4805 = vpow2.f32 %v377_v39  ;;  %v376_v41 = vsub.f32 %v366_v34, %v374_v40 }
 0x2a5   :  { %v379_v42 = vmul.f32 1.442695, %v376_v41 }
 0x2a7   :  { %4807 = vpow2.f32 %v379_v42 }
 0x2b0   :  { %v4806_v43 = vpop.eup %4805 }
 0x2b1   :  { %v381_v44 = vsel %vm217_vm2, %v4806_v43, 0.0 }
 0x2b2   :  { %382 = vadd.xlane.f32.xlu0 %v381_v44 }
 0x2b4   :  { %v4808_v45 = vpop.eup %4807 }
 0x2b5   :  { %v384_v46 = vsel %vm217_vm2, %v4808_v45, 0.0 }
 0x2b6   :  { %385 = vadd.xlane.f32.xlu1 %v384_v46 }
 0x2c7   :  { %393 = vrot.lane.b32.xlu1 %v5066_v10, %s4934_s21 }
 0x2c8   :  { %629 = vrot.lane.b32.xlu0 %v5066_v10, %s4935_s22 }
 0x2cb   :  { %469 = vrot.lane.b32.xlu1 %v5070_v11, %s4934_s21 }
 0x2cf   :  { %631 = vrot.lane.b32.xlu1 %v5066_v10, %s4936_s23 }
 0x2d3   :  { %709 = vrot.lane.b32.xlu1 %v5070_v11, %s4936_s23 }
 0x2d7   :  { %707 = vrot.lane.b32.xlu1 %v5070_v11, %s4935_s22 }
 0x33b   :  { %v383_v47 = vpop.xlane.xlu0 %382 }
 0x33c   :  { %v387_v48 = vmax.f32 %v383_v47, 1e-06 }
 0x33e   :  { %4809 = vrcp.f32 %v387_v48 }
 0x33f   :  { %v386_v49 = vpop.xlane.xlu1 %385  ;;  %v630_v58 = vpop.permute.xlu0 %629 }
 0x340   :  { %v388_v50 = vmax.f32 %v386_v49, 1e-06 }
 0x342   :  { %4811 = vrcp.f32 %v388_v50 }
 0x343   :  { %v394_v51 = vpop.permute.xlu1 %393 }
 0x344   :  { %4524 = vmatpush3.msra.mxu0 %v394_v51 }
 0x345   :  { %4533 = vmatprep.subr.mxu0 %v545_v59 }
 0x347   :  { %v470_v52 = vpop.permute.xlu1 %469 }
 0x348   :  { %4529 = vmatpush3.msra.mxu1 %v470_v52 }
 0x349   :  { %4538 = vmatprep.subr.mxu1 %v4930_v6 }
 0x34b   :  { %v4810_v53 = vpop.eup %4809  ;;  %v632_v57 = vpop.permute.xlu1 %631 }
 0x34c   :  { %v391_v54 = vmul.f32 %v4810_v53, %v4806_v43  ;;  %v4265_v43 = vld [vmem:[%s5617_s5 + $0x8] sm:$0xff] }
 0x34e   :  { %4526 = vmatmul.mubr.msk.f32.vlgmr.msra.gmra.mxu0 %vm217_vm2, %v391_v54 }
 0x34f   :  { %v4812_v55 = vpop.eup %4811  ;;  %4534 = vmatpush3.msra.mxu0 %v545_v59  ;;  %v710_v61 = vpop.permute.xlu1 %709  ;;  %v213_v59 = vadd.f32 %v5137_v16, %v5053_v5 }
 0x350   :  { %v392_v56 = vmul.f32 %v4812_v55, %v4808_v45  ;;  %4543 = vmatprep.subr.mxu0 %v4930_v6 }
 0x352   :  { %4531 = vmatmul.mubr.msk.f32.vlgmr.msra.gmra.mxu1 %vm217_vm2, %v392_v56 }
 0x353   :  { %4539 = vmatpush3.xpose.msk.msra.mxu1 %vm217_vm2, %v632_v57  ;;  %4540 = vmatprep.mubr.msk.f32.mxu1 %vm4931_vm1, %v4930_v6  ;;  %v708_v1 = vpop.permute.xlu1 %707 }
 0x354   :  { %4548 = vmatprep.subr.mxu1 %v4930_v6 }
 0x356   :  { %4541 = vmatmul.mubr.msk.f32.vlgmr.msra.gmra.mxu1 %vm217_vm2, %v630_v58 }
 0x357   :  { %4550 = vmatprep.mubr.msk.f32.mxu1 %vm4931_vm1, %v4930_v6 }
 0x40e   :  { %v465_v60 = vpop.f32.mrf.mxu0 }
 0x40f   :  { %4535 = vmatprep.mubr.msk.f32.mxu0 %vm217_vm2, %v465_v60 }
 0x410   :  { %v4527_v62 = vpop.f32.mrf.mxu0 }
 0x412   :  { %v541_v63 = vpop.f32.mrf.mxu1 }
 0x413   :  { %4536 = vmatmul.mubr.msk.f32.vlgmr.msra.gmra.mxu0 %vm217_vm2, %v541_v63 }
 0x414   :  { %4544 = vmatpush3.xpose.msk.msra.mxu0 %vm217_vm2, %v710_v61  ;;  %v4532_v0 = vpop.f32.mrf.mxu1  ;;  %4545 = vmatprep.mubr.msk.f32.mxu0 %vm4931_vm1, %v4930_v6 }
 0x415   :  { %4553 = vmatprep.subr.mxu0 %v4930_v6 }
 0x416   :  { %v703_v3 = vpop.f32.mrf.mxu1 }
 0x417   :  { %v704_v4 = vadd.f32 %v703_v3, %v5086_v26  ;;  %4546 = vmatmul.mubr.msk.f32.vlgmr.msra.gmra.mxu0 %vm217_vm2, %v708_v1 }
 0x418   :  { %v4542_v7 = vpop.f32.mrf.mxu1  ;;  %4555 = vmatprep.mubr.msk.f32.mxu0 %vm4931_vm1, %v4930_v6 }
 0x419   :  { %v785_v8 = vsel %vm217_vm2, %v704_v4, -inf }
 0x41a   :  { %786 = vmax.xlane.f32.xlu1 %v785_v8 }
 0x4a3   :  { %v787_v9 = vpop.xlane.xlu1 %786 }
 0x4a4   :  { %v791_v12 = vsub.f32 %v704_v4, %v787_v9 }
 0x4a6   :  { %v793_v13 = vmul.f32 1.442695, %v791_v12 }
 0x4a8   :  { %4813 = vpow2.f32 %v793_v13 }
 0x4b5   :  { %v4814_v14 = vpop.eup %4813 }
 0x4b6   :  { %v797_v15 = vsel %vm217_vm2, %v4814_v14, 0.0 }
 0x4b7   :  { %798 = vadd.xlane.f32.xlu1 %v797_v15 }
 0x4d3   :  { %v5141_v18 = vpop.f32.mrf.mxu0 }
 0x4d4   :  { %v628_v60 = vadd.f32 %v5141_v18, %v213_v59 }
 0x4d5   :  { %v618_v19 = vpop.f32.mrf.mxu0 }
 0x4d6   :  { %v5143_v20 = vadd.f32 %v618_v19, %v212_v17  ;;  %v4274_v19 = vld [vmem:[%s5617_s5 + $0x10] sm:$0xff] }
 0x4d7   :  { %v781_v21 = vpop.f32.mrf.mxu0 }
 0x4d8   :  { %v782_v22 = vadd.f32 %v781_v21, %v5089_v30 }
 0x4d9   :  { %v4547_v23 = vpop.f32.mrf.mxu0 }
 0x4da   :  { %v788_v24 = vsel %vm217_vm2, %v782_v22, -inf }
 0x4db   :  { %789 = vmax.xlane.f32.xlu0 %v788_v24 }
 0x4f1   :  { %885 = vrot.lane.b32.xlu0 %v5070_v11, %s4937_s28 }
 0x4f5   :  { %1046 = vrot.lane.b32.xlu0 %v5066_v10, %s4938_s29 }
 0x540   :  { %v799_v32 = vpop.xlane.xlu1 %798 }
 0x541   :  { %v803_v33 = vmax.f32 %v799_v32, 1e-06 }
 0x564   :  { %v790_v2 = vpop.xlane.xlu0 %789 }
 0x565   :  { %v792_v25 = vsub.f32 %v782_v22, %v790_v2 }
 0x567   :  { %v795_v27 = vmul.f32 1.442695, %v792_v25 }
 0x568   :  { %v886_v28 = vpop.permute.xlu0 %885 }
 0x569   :  { %4815 = vpow2.f32 %v795_v27  ;;  %4554 = vmatpush3.msra.mxu0 %v886_v28 }
 0x56a   :  { %4563 = vmatprep.subr.mxu0 %v4930_v6  ;;  %4817 = vrcp.f32 %v803_v33 }
 0x56c   :  { %v1047_v42 = vpop.permute.xlu0 %1046 }
 0x576   :  { %v4816_v29 = vpop.eup %4815 }
 0x577   :  { %v800_v31 = vsel %vm217_vm2, %v4816_v29, 0.0  ;;  %v4818_v35 = vpop.eup %4817 }
 0x578   :  { %801 = vadd.xlane.f32.xlu1 %v800_v31  ;;  %v807_v38 = vmul.f32 %v4818_v35, %v4814_v14 }
 0x589   :  { %809 = vrot.lane.b32.xlu1 %v5066_v10, %s4937_s28 }
 0x58d   :  { %1048 = vrot.lane.b32.xlu1 %v5066_v10, %s4939_s1 }
 0x591   :  { %1126 = vrot.lane.b32.xlu1 %v5070_v11, %s4939_s1 }
 0x595   :  { %1124 = vrot.lane.b32.xlu1 %v5070_v11, %s4938_s29 }
 0x601   :  { %v802_v34 = vpop.xlane.xlu1 %801 }
 0x602   :  { %v804_v36 = vmax.f32 %v802_v34, 1e-06 }
 0x604   :  { %4819 = vrcp.f32 %v804_v36 }
 0x605   :  { %v810_v37 = vpop.permute.xlu1 %809 }
 0x606   :  { %4549 = vmatpush3.msra.mxu1 %v810_v37 }
 0x607   :  { %4551 = vmatmul.mubr.msk.f32.vlgmr.msra.gmra.mxu1 %vm217_vm2, %v807_v38  ;;  %4558 = vmatprep.subr.mxu1 %v4265_v43 }
 0x608   :  { %4559 = vmatpush3.msra.mxu1 %v4265_v43 }
 0x609   :  { %v1049_v41 = vpop.permute.xlu1 %1048  ;;  %4568 = vmatprep.subr.mxu1 %v4930_v6 }
 0x60d   :  { %v1127_v46 = vpop.permute.xlu1 %1126 }
 0x611   :  { %v4820_v39 = vpop.eup %4819  ;;  %v1125_v49 = vpop.permute.xlu1 %1124 }
 0x612   :  { %v808_v40 = vmul.f32 %v4820_v39, %v4816_v29 }
 0x614   :  { %4556 = vmatmul.mubr.msk.f32.vlgmr.msra.gmra.mxu0 %vm217_vm2, %v808_v40 }
 0x615   :  { %4564 = vmatpush3.xpose.msk.msra.mxu0 %vm217_vm2, %v1049_v41  ;;  %4565 = vmatprep.mubr.msk.f32.mxu0 %vm4931_vm1, %v4930_v6 }
 0x616   :  { %4573 = vmatprep.subr.mxu0 %v4930_v6 }
 0x618   :  { %4566 = vmatmul.mubr.msk.f32.vlgmr.msra.gmra.mxu0 %vm217_vm2, %v1047_v42 }
 0x619   :  { %4575 = vmatprep.mubr.msk.f32.mxu0 %vm4931_vm1, %v4930_v6 }
 0x6c7   :  { %v881_v44 = vpop.f32.mrf.mxu1 }
 0x6c8   :  { %4560 = vmatprep.mubr.msk.f32.mxu1 %vm217_vm2, %v881_v44 }
 0x6c9   :  { %v4552_v45 = vpop.f32.mrf.mxu1 }
 0x6d4   :  { %v957_v47 = vpop.f32.mrf.mxu0 }
 0x6d5   :  { %4561 = vmatmul.mubr.msk.f32.vlgmr.msra.gmra.mxu1 %vm217_vm2, %v957_v47 }
 0x6d6   :  { %4569 = vmatpush3.xpose.msk.msra.mxu1 %vm217_vm2, %v1127_v46  ;;  %v4557_v48 = vpop.f32.mrf.mxu0  ;;  %4570 = vmatprep.mubr.msk.f32.mxu1 %vm4931_vm1, %v4930_v6 }
 0x6d7   :  { %4578 = vmatprep.subr.mxu1 %v4930_v6 }
 0x6d8   :  { %v1120_v50 = vpop.f32.mrf.mxu0 }
 0x6d9   :  { %v1121_v51 = vadd.f32 %v1120_v50, %v5086_v26  ;;  %4571 = vmatmul.mubr.msk.f32.vlgmr.msra.gmra.mxu1 %vm217_vm2, %v1125_v49 }
 0x6da   :  { %v4567_v52 = vpop.f32.mrf.mxu0  ;;  %4580 = vmatprep.mubr.msk.f32.mxu1 %vm4931_vm1, %v4930_v6 }
 0x6db   :  { %v1202_v53 = vsel %vm217_vm2, %v1121_v51, -inf }
 0x6dc   :  { %1203 = vmax.xlane.f32.xlu0 %v1202_v53 }
 0x765   :  { %v1204_v54 = vpop.xlane.xlu0 %1203 }
 0x766   :  { %v1208_v55 = vsub.f32 %v1121_v51, %v1204_v54 }
 0x768   :  { %v1210_v56 = vmul.f32 1.442695, %v1208_v55 }
 0x76a   :  { %4821 = vpow2.f32 %v1210_v56 }
 0x777   :  { %v4822_v57 = vpop.eup %4821 }
 0x778   :  { %v1214_v58 = vsel %vm217_vm2, %v4822_v57, 0.0 }
 0x779   :  { %1215 = vadd.xlane.f32.xlu0 %v1214_v58 }
 0x795   :  { %v4562_v61 = vpop.f32.mrf.mxu1 }
 0x796   :  { %v5189_v62 = vadd.f32 %v4562_v61, %v628_v60 }
 0x797   :  { %v1035_v63 = vpop.f32.mrf.mxu1 }
 0x798   :  { %v5192_v0 = vadd.f32 %v1035_v63, %v5143_v20 }
 0x799   :  { %v1198_v1 = vpop.f32.mrf.mxu1 }
 0x79a   :  { %v1199_v3 = vadd.f32 %v1198_v1, %v5089_v30 }
 0x79b   :  { %v4572_v4 = vpop.f32.mrf.mxu1 }
 0x79c   :  { %v1205_v7 = vsel %vm217_vm2, %v1199_v3, -inf }
 0x79d   :  { %1206 = vmax.xlane.f32.xlu1 %v1205_v7 }
 0x7ae   :  { %1226 = vrot.lane.b32.xlu1 %v5066_v10, %s4940_s17 }
 0x7b2   :  { %1465 = vrot.lane.b32.xlu1 %v5066_v10, %s4941_s18 }
 0x7b6   :  { %1543 = vrot.lane.b32.xlu1 %v5070_v11, %s4941_s18 }
 0x7ba   :  { %1541 = vrot.lane.b32.xlu1 %v5070_v11, %s5630_s0 }
 0x802   :  { %v1216_v5 = vpop.xlane.xlu0 %1215 }
 0x803   :  { %v1220_v8 = vmax.f32 %v1216_v5, 1e-06 }
 0x805   :  { %4823 = vrcp.f32 %v1220_v8 }
 0x812   :  { %v4824_v12 = vpop.eup %4823 }
 0x813   :  { %v1224_v16 = vmul.f32 %v4824_v12, %v4822_v57 }
 0x826   :  { %v1207_v9 = vpop.xlane.xlu1 %1206 }
 0x827   :  { %v1209_v13 = vsub.f32 %v1199_v3, %v1207_v9 }
 0x829   :  { %v1212_v14 = vmul.f32 1.442695, %v1209_v13 }
 0x82a   :  { %v1227_v15 = vpop.permute.xlu1 %1226 }
 0x82b   :  { %4825 = vpow2.f32 %v1212_v14  ;;  %4574 = vmatpush3.msra.mxu0 %v1227_v15  ;;  %v4944_v15 = vmov 0  }
 0x82c   :  { %4576 = vmatmul.mubr.msk.f32.vlgmr.msra.gmra.mxu0 %vm217_vm2, %v1224_v16  ;;  %4583 = vmatprep.subr.mxu0 %v4274_v19 }
 0x82d   :  { %4584 = vmatpush3.msra.mxu0 %v4274_v19  ;;  %4804 = vset.pattern.permute.xlu0 %v4944_v15 }
 0x82e   :  { %4593 = vmatprep.subr.mxu0 %v4930_v6  ;;  %v1466_v2 = vpop.permute.xlu1 %1465  ;;  %4803 = vset.pattern.permute.xlu1 %v4944_v15 }
 0x832   :  { %v1544_v29 = vpop.permute.xlu1 %1543 }
 0x836   :  { %v1542_v33 = vpop.permute.xlu1 %1541 }
 0x838   :  { %v4826_v17 = vpop.eup %4825 }
 0x839   :  { %v1217_v18 = vsel %vm217_vm2, %v4826_v17, 0.0 }
 0x83a   :  { %1218 = vadd.xlane.f32.xlu0 %v1217_v18 }
 0x850   :  { %1302 = vrot.lane.b32.xlu0 %v5070_v11, %s4940_s17 }
 0x854   :  { %1463 = vrot.lane.b32.xlu0 %v5066_v10, %s5630_s0 }
 0x8c3   :  { %v1219_v20 = vpop.xlane.xlu0 %1218 }
 0x8c4   :  { %v1221_v21 = vmax.f32 %v1219_v20, 1e-06 }
 0x8c6   :  { %4827 = vrcp.f32 %v1221_v21 }
 0x8c7   :  { %v1303_v22 = vpop.permute.xlu0 %1302 }
 0x8c8   :  { %4579 = vmatpush3.msra.mxu1 %v1303_v22 }
 0x8c9   :  { %4588 = vmatprep.subr.mxu1 %v4930_v6 }
 0x8cb   :  { %v1464_v25 = vpop.permute.xlu0 %1463 }
 0x8d3   :  { %v4828_v23 = vpop.eup %4827 }
 0x8d4   :  { %v1225_v24 = vmul.f32 %v4828_v23, %v4826_v17 }
 0x8d6   :  { %4581 = vmatmul.mubr.msk.f32.vlgmr.msra.gmra.mxu1 %vm217_vm2, %v1225_v24 }
 0x8d7   :  { %4589 = vmatpush3.xpose.msk.msra.mxu1 %vm217_vm2, %v1466_v2  ;;  %4590 = vmatprep.mubr.msk.f32.mxu1 %vm4931_vm1, %v4930_v6 }
 0x8d8   :  { %4598 = vmatprep.subr.mxu1 %v4930_v6 }
 0x8da   :  { %4591 = vmatmul.mubr.msk.f32.vlgmr.msra.gmra.mxu1 %vm217_vm2, %v1464_v25  ;;  %v65_v25 = vld [vmem:[%s5614_s2] sm:$0xff] }
 0x8db   :  { %4600 = vmatprep.mubr.msk.f32.mxu1 %vm4931_vm1, %v4930_v6 }
 0x8ec   :  { %v1298_v27 = vpop.f32.mrf.mxu0 }
 0x8ed   :  { %4585 = vmatprep.mubr.msk.f32.mxu0 %vm217_vm2, %v1298_v27  ;;  %v1930_v27 = vld [vmem:[%s5621_s9 + $0x18] sm:$0xff] }
 0x8ee   :  { %v4577_v28 = vpop.f32.mrf.mxu0 }
 0x8ef   :  { %v1929_v28 = vld [vmem:[%s5621_s9 + $0x10] sm:$0xff] }
 0x996   :  { %v1374_v31 = vpop.f32.mrf.mxu1 }
 0x997   :  { %4586 = vmatmul.mubr.msk.f32.vlgmr.msra.gmra.mxu0 %vm217_vm2, %v1374_v31  ;;  %v1928_v31 = vld [vmem:[%s5621_s9 + $0x8] sm:$0xff] }
 0x998   :  { %4594 = vmatpush3.xpose.msk.msra.mxu0 %vm217_vm2, %v1544_v29  ;;  %v4582_v32 = vpop.f32.mrf.mxu1  ;;  %4595 = vmatprep.mubr.msk.f32.mxu0 %vm4931_vm1, %v4930_v6  ;;  %v66_v29 = vld [vmem:[%s5614_s2 + $0x8] sm:$0xff] }
 0x999   :  { %4603 = vmatprep.subr.mxu0 %v4930_v6  ;;  %v1927_v32 = vld [vmem:[%s5621_s9] sm:$0xff] }
 0x99a   :  { %v1537_v34 = vpop.f32.mrf.mxu1 }
 0x99b   :  { %v1538_v35 = vadd.f32 %v1537_v34, %v5086_v26  ;;  %4596 = vmatmul.mubr.msk.f32.vlgmr.msra.gmra.mxu0 %vm217_vm2, %v1542_v33  ;;  %v2028_v33 = vld [vmem:[%s5623_s11 + $0x38] sm:$0xff]  ;;  %v2027_v34 = vld [vmem:[%s5623_s11 + $0x30] sm:$0xff] }
 0x99c   :  { %v4592_v36 = vpop.f32.mrf.mxu1  ;;  %4605 = vmatprep.mubr.msk.f32.mxu0 %vm4931_vm1, %v4930_v6 }
 0x99d   :  { %v1619_v37 = vsel %vm217_vm2, %v1538_v35, -inf  ;;  %v2025_v36 = vld [vmem:[%s5623_s11 + $0x20] sm:$0xff] }
 0x99e   :  { %1620 = vmax.xlane.f32.xlu0 %v1619_v37 }
 0xa27   :  { %v1621_v38 = vpop.xlane.xlu0 %1620 }
 0xa28   :  { %v1625_v39 = vsub.f32 %v1538_v35, %v1621_v38  ;;  %v2026_v35 = vld [vmem:[%s5623_s11 + $0x28] sm:$0xff] }
 0xa2a   :  { %v1627_v40 = vmul.f32 1.442695, %v1625_v39 }
 0xa2c   :  { %4829 = vpow2.f32 %v1627_v40 }
 0xa39   :  { %v4830_v41 = vpop.eup %4829 }
 0xa3a   :  { %v1631_v42 = vsel %vm217_vm2, %v4830_v41, 0.0 }
 0xa3b   :  { %1632 = vadd.xlane.f32.xlu0 %v1631_v42 }
 0xa57   :  { %v4587_v43 = vpop.f32.mrf.mxu0 }
 0xa58   :  { %v1462_v44 = vadd.f32 %v4587_v43, %v5189_v62 }
 0xa59   :  { %v1452_v45 = vpop.f32.mrf.mxu0 }
 0xa5a   :  { %v1461_v46 = vadd.f32 %v1452_v45, %v5192_v0 }
 0xa5b   :  { %v1615_v47 = vpop.f32.mrf.mxu0 }
 0xa5c   :  { %v1616_v48 = vadd.f32 %v1615_v47, %v5089_v30 }
 0xa5d   :  { %v4597_v49 = vpop.f32.mrf.mxu0 }
 0xa5e   :  { %v1622_v50 = vsel %vm217_vm2, %v1616_v48, -inf }
 0xa5f   :  { %1623 = vmax.xlane.f32.xlu1 %v1622_v50 }
 0xa70   :  { %1643 = vrot.lane.b32.xlu1 %v5066_v10, %s5628_s25  ;;  %v4283_v10 = vld [vmem:[%s5617_s5 + $0x18] sm:$0xff] }
 0xac4   :  { %v1633_v51 = vpop.xlane.xlu0 %1632 }
 0xac5   :  { %v1637_v52 = vmax.f32 %v1633_v51, 1e-06 }
 0xac7   :  { %4831 = vrcp.f32 %v1637_v52 }
 0xad4   :  { %v4832_v54 = vpop.eup %4831 }
 0xad5   :  { %v1641_v58 = vmul.f32 %v4832_v54, %v4830_v41 }
 0xae8   :  { %v1624_v53 = vpop.xlane.xlu1 %1623 }
 0xae9   :  { %v1626_v55 = vsub.f32 %v1616_v48, %v1624_v53  ;;  %v4287_v48 = vld [vmem:[%s5620_s8] ss:$0 sm:$0xff] }
 0xaeb   :  { %v1629_v56 = vmul.f32 1.442695, %v1626_v55 }
 0xaec   :  { %v1644_v57 = vpop.permute.xlu1 %1643 }
 0xaed   :  { %4833 = vpow2.f32 %v1629_v56  ;;  %4599 = vmatpush3.msra.mxu1 %v1644_v57  ;;  %v2024_v57 = vld [vmem:[%s5623_s11 + $0x18] sm:$0xff] }
 0xaee   :  { %4601 = vmatmul.mubr.msk.f32.vlgmr.msra.gmra.mxu1 %vm217_vm2, %v1641_v58  ;;  %4608 = vmatprep.subr.mxu1 %v4283_v10  ;;  %v2023_v58 = vld [vmem:[%s5623_s11 + $0x10] sm:$0xff] }
 0xaef   :  { %4609 = vmatpush3.msra.mxu1 %v4283_v10  ;;  %v4288_v10 = vld [vmem:[%s5622_s10] ss:$0 sm:$0xff] }
 0xaf0   :  { %4624 = vmatprep.subr.mxu1 %v2028_v33 }
 0xafa   :  { %v4834_v59 = vpop.eup %4833 }
 0xafb   :  { %v1634_v60 = vsel %vm217_vm2, %v4834_v59, 0.0 }
 0xafc   :  { %1635 = vadd.xlane.f32.xlu0 %v1634_v60  ;;  %v2021_v60 = vld [vmem:[%s5623_s11] sm:$0xff] }
 0xb12   :  { %1719 = vrot.lane.b32.xlu0 %v5070_v11, %s5628_s25 }
 0xb85   :  { %v1636_v61 = vpop.xlane.xlu0 %1635 }
 0xb86   :  { %v1638_v62 = vmax.f32 %v1636_v61, 1e-06 }
 0xb88   :  { %4835 = vrcp.f32 %v1638_v62 }
 0xb89   :  { %v1720_v63 = vpop.permute.xlu0 %1719 }
 0xb8a   :  { %4604 = vmatpush3.msra.mxu0 %v1720_v63 }
 0xb8b   :  { %4613 = vmatprep.subr.mxu0 %v1930_v27 }
 0xb95   :  { %v4836_v0 = vpop.eup %4835 }
 0xb96   :  { %v1642_v1 = vmul.f32 %v4836_v0, %v4834_v59  ;;  %v2022_v59 = vld [vmem:[%s5623_s11 + $0x8] sm:$0xff] }
 0xb98   :  { %4606 = vmatmul.mubr.msk.f32.vlgmr.msra.gmra.mxu0 %vm217_vm2, %v1642_v1 }
 0xb99   :  { %4614 = vmatpush3.msra.mxu0 %v1930_v27  ;;  %v4297_v27 = vld [vmem:[%s5615_s3 + $0x28] sm:$0xff] }
 0xb9a   :  { %4615 = vmatprep.subr.mxu0 %v1929_v28 }
 0xb9b   :  { %4616 = vmatpush3.msra.mxu0 %v1929_v28  ;;  %v4296_v28 = vld [vmem:[%s5615_s3 + $0x20] sm:$0xff] }
 0xb9c   :  { %4617 = vmatprep.subr.mxu0 %v1928_v31 }
 0xb9d   :  { %4618 = vmatpush3.msra.mxu0 %v1928_v31 }
 0xb9e   :  { %4619 = vmatprep.subr.mxu0 %v1927_v32 }
 0xb9f   :  { %4620 = vmatpush3.msra.mxu0 %v1927_v32 }
 0xbae   :  { %v1715_v3 = vpop.f32.mrf.mxu1 }
 0xbaf   :  { %4610 = vmatprep.mubr.msk.f32.mxu1 %vm217_vm2, %v1715_v3 }
 0xbb0   :  { %v4602_v4 = vpop.f32.mrf.mxu1 }
 0xbb1   :  { %v4291_v4 = vld [vmem:[%s5624_s12] ss:$0 sm:$0xff] }
 0xc58   :  { %v1791_v11 = vpop.f32.mrf.mxu0 }
 0xc59   :  { %4611 = vmatmul.mubr.msk.f32.vlgmr.msra.gmra.mxu1 %vm217_vm2, %v1791_v11 }
 0xc5a   :  { %v4607_v7 = vpop.f32.mrf.mxu0  ;;  %4625 = vmatpush3.msra.mxu1 %v2028_v33 }
 0xc5b   :  { %4626 = vmatprep.subr.mxu1 %v2027_v34 }
 0xc5c   :  { %4627 = vmatpush3.msra.mxu1 %v2027_v34 }
 0xc5d   :  { %4628 = vmatprep.subr.mxu1 %v2026_v35 }
 0xc5e   :  { %4629 = vmatpush3.msra.mxu1 %v2026_v35 }
 0xc5f   :  { %4630 = vmatprep.subr.mxu1 %v2025_v36 }
 0xc60   :  { %4631 = vmatpush3.msra.mxu1 %v2025_v36 }
 0xc61   :  { %4632 = vmatprep.subr.mxu1 %v2024_v57 }
 0xc62   :  { %4633 = vmatpush3.msra.mxu1 %v2024_v57 }
 0xc63   :  { %4634 = vmatprep.subr.mxu1 %v2023_v58 }
 0xc64   :  { %4635 = vmatpush3.msra.mxu1 %v2023_v58 }
 0xc65   :  { %4636 = vmatprep.subr.mxu1 %v2022_v59 }
 0xc66   :  { %4637 = vmatpush3.msra.mxu1 %v2022_v59 }
 0xc67   :  { %4638 = vmatprep.subr.mxu1 %v2021_v60 }
 0xc68   :  { %4639 = vmatpush3.msra.mxu1 %v2021_v60 }
 0xc69   :  { %4659 = vmatprep.subr.mxu1 %v4930_v6 }
 0xd19   :  { %v4612_v5 = vpop.f32.mrf.mxu1 }
 0xd1a   :  { %v1879_v8 = vadd.f32 %v4612_v5, %v1462_v44  ;;  %v4286_v44 = vld [vmem:[%s5619_s7] ss:$0 sm:$0xff] }
 0xd1b   :  { %v1869_v9 = vpop.f32.mrf.mxu1 }
 0xd1c   :  { %v1878_v12 = vadd.f32 %v1869_v9, %v1461_v46  ;;  %v1883_v13 = vsel %vm123_vm0, %v1879_v8, 0.0 }
 0xd1d   :  { %1884 = vadd.xlane.f32.xlu0 %v1883_v13 }
 0xd1e   :  { %v1880_v14 = vsel %vm123_vm0, %v1878_v12, 0.0 }
 0xd1f   :  { %1881 = vadd.xlane.f32.xlu1 %v1880_v14 }
 0xda6   :  { %v1885_v16 = vpop.xlane.xlu0 %1884 }
 0xda7   :  { %v1888_v17 = vmul.f32 0.03125, %v1885_v16 }
 0xda8   :  { %v1882_v18 = vpop.xlane.xlu1 %1881 }
 0xda9   :  { %v1890_v19 = vsub.f32 %v1879_v8, %v1888_v17  ;;  %v1887_v20 = vmul.f32 0.03125, %v1882_v18 }
 0xdab   :  { %v1889_v21 = vsub.f32 %v1878_v12, %v1887_v20  ;;  %v1892_v22 = vmul.f32 %v1890_v19, %v1890_v19 }
 0xdad   :  { %v1896_v23 = vsel %vm123_vm0, %v1892_v22, 0.0  ;;  %v1891_v24 = vmul.f32 %v1889_v21, %v1889_v21 }
 0xdae   :  { %1897 = vadd.xlane.f32.xlu0 %v1896_v23 }
 0xdaf   :  { %v1893_v2 = vsel %vm123_vm0, %v1891_v24, 0.0 }
 0xdb0   :  { %1894 = vadd.xlane.f32.xlu1 %v1893_v2  ;;  %v4299_v2 = vld [vmem:[%s5615_s3 + $0x38] sm:$0xff] }
 0xdb1   :  { %4643 = vmatprep.subr.mxu0 %v4299_v2 }
 0xdc1   :  { %69 = vperm.xlu1 %4803, %v65_v25   ;;  %v4298_v25 = vld [vmem:[%s5615_s3 + $0x30] sm:$0xff] }
 0xdc4   :  { %74 = vperm.xlu0 %4804, %v66_v29  }
 0xe37   :  { %v1898_v37 = vpop.xlane.xlu0 %1897 }
 0xe38   :  { %v1900_v38 = vmul.f32 0.03125, %v1898_v37  ;;  %v4294_v37 = vld [vmem:[%s5625_s13] ss:$0 sm:$0xff] }
 0xe39   :  { %v1895_v39 = vpop.xlane.xlu1 %1894 }
 0xe3a   :  { %v1902_v40 = vadd.f32 1e-05, %v1900_v38  ;;  %v1899_v41 = vmul.f32 0.03125, %v1895_v39  ;;  %v4295_v39 = vld [vmem:[%s5626_s14] ss:$0 sm:$0xff] }
 0xe3c   :  { %4837 = vrsqrt.f32 %v1902_v40  ;;  %v1901_v42 = vadd.f32 1e-05, %v1899_v41 }
 0xe3d   :  { %v5291_v52 = vpop.permute.xlu1 %69 }
 0xe3e   :  { %4839 = vrsqrt.f32 %v1901_v42 }
 0xe3f   :  { %v5293_v53 = vpop.permute.xlu0 %74 }
 0xe49   :  { %v4838_v43 = vpop.eup %4837 }
 0xe4a   :  { %v1906_v45 = vmul.f32 %v4838_v43, %v1890_v19 }
 0xe4b   :  { %v4840_v46 = vpop.eup %4839 }
 0xe4c   :  { %v1915_v47 = vmul.f32 %v4286_v44, %v1906_v45  ;;  %v1905_v49 = vmul.f32 %v4840_v46, %v1889_v21 }
 0xe4e   :  { %v1914_v50 = vmul.f32 %v4286_v44, %v1905_v49  ;;  %v1924_v51 = vadd.f32 %v4287_v48, %v1915_v47 }
 0xe50   :  { %v1923_v54 = vadd.f32 %v4287_v48, %v1914_v50  ;;  %v1926_v56 = vmul.f32 %v1924_v51, %v5293_v53  ;;  %v4301_v48 = vld [vmem:[%s5616_s4 + $0x1] ss:$0 sm:$0xff] }
 0xe52   :  { %v1925_v55 = vmul.f32 %v1923_v54, %v5291_v52 }
 0xe54   :  { %4621 = vmatprep.mubr.msk.f32.mxu0 %vm123_vm0, %v1925_v55 }
 0xe55   :  { %4622 = vmatmul.mubr.msk.f32.vlgmr.msra.gmra.mxu0 %vm123_vm0, %v1926_v56 }
 0xe56   :  { %4644 = vmatpush3.msra.mxu0 %v4299_v2 }
 0xe57   :  { %4645 = vmatprep.subr.mxu0 %v4298_v25 }
 0xe58   :  { %4646 = vmatpush3.msra.mxu0 %v4298_v25  ;;  %v4312_v25 = vld [vmem:[%s5617_s5 + $0x20] sm:$0xff] }
 0xe59   :  { %4647 = vmatprep.subr.mxu0 %v4297_v27 }
 0xe5a   :  { %4648 = vmatpush3.msra.mxu0 %v4297_v27 }
 0xe5b   :  { %4649 = vmatprep.subr.mxu0 %v4296_v28 }
 0xe5c   :  { %4650 = vmatpush3.msra.mxu0 %v4296_v28 }
 0xe5d   :  { %4654 = vmatprep.subr.mxu0 %v4930_v6 }
 0xf15   :  { %v4623_v61 = vpop.f32.mrf.mxu0 }
 0xf16   :  { %v2016_v62 = vadd.f32 %v4623_v61, %v4288_v10 }
 0xf17   :  { %v2010_v63 = vpop.f32.mrf.mxu0 }
 0xf18   :  { %v2011_v0 = vadd.f32 %v4288_v10, %v2010_v63  ;;  %v2020_v3 = vmax.f32 %v2016_v62, 0.0 }
 0xf1a   :  { %v2019_v1 = vmax.f32 %v2011_v0, 0.0 }
 0xf1c   :  { %4640 = vmatprep.mubr.msk.f32.mxu1 %vm2036_vm3, %v2019_v1 }
 0xf1d   :  { %4641 = vmatmul.mubr.msk.f32.vlgmr.msra.gmra.mxu1 %vm2036_vm3, %v2020_v3 }
 0xf1e   :  { %4661 = vmatprep.mubr.msk.f32.mxu1 %vm4931_vm1, %v4930_v6 }
 0xfdd   :  { %v4642_v11 = vpop.f32.mrf.mxu1 }
 0xfde   :  { %v2115_v7 = vadd.f32 %v4642_v11, %v4291_v4 }
 0xfdf   :  { %v2109_v5 = vpop.f32.mrf.mxu1 }
 0xfe0   :  { %v2110_v8 = vadd.f32 %v4291_v4, %v2109_v5  ;;  %v2119_v9 = vadd.f32 %v2115_v7, %v1926_v56 }
 0xfe2   :  { %v2123_v12 = vsel %vm123_vm0, %v2119_v9, 0.0  ;;  %v2118_v13 = vadd.f32 %v2110_v8, %v1925_v55 }
 0xfe3   :  { %2124 = vadd.xlane.f32.xlu0 %v2123_v12 }
 0xfe4   :  { %v2120_v14 = vsel %vm123_vm0, %v2118_v13, 0.0 }
 0xfe5   :  { %2121 = vadd.xlane.f32.xlu1 %v2120_v14 }
0x106c   :  { %v2125_v15 = vpop.xlane.xlu0 %2124 }
0x106d   :  { %v2127_v16 = vmul.f32 0.03125, %v2125_v15 }
0x106e   :  { %v2122_v17 = vpop.xlane.xlu1 %2121 }
0x106f   :  { %v2126_v18 = vmul.f32 0.03125, %v2122_v17  ;;  %v2129_v19 = vsub.f32 %v2119_v9, %v2127_v16 }
0x1071   :  { %v2128_v20 = vsub.f32 %v2118_v13, %v2126_v18  ;;  %v2131_v23 = vmul.f32 %v2129_v19, %v2129_v19 }
0x1073   :  { %v2130_v21 = vmul.f32 %v2128_v20, %v2128_v20  ;;  %v2135_v24 = vsel %vm123_vm0, %v2131_v23, 0.0 }
0x1075   :  { %v2132_v22 = vsel %vm123_vm0, %v2130_v21, 0.0 }
0x1076   :  { %2133 = vadd.xlane.f32.xlu1 %v2132_v22 }
0x107a   :  { %2136 = vadd.xlane.f32.xlu1 %v2135_v24 }
0x10ff   :  { %v2134_v29 = vpop.xlane.xlu1 %2133 }
0x1100   :  { %v2138_v31 = vmul.f32 0.03125, %v2134_v29 }
0x1102   :  { %v2140_v32 = vadd.f32 1e-05, %v2138_v31 }
0x1103   :  { %v2137_v33 = vpop.xlane.xlu1 %2136 }
0x1104   :  { %4841 = vrsqrt.f32 %v2140_v32  ;;  %v2139_v34 = vmul.f32 0.03125, %v2137_v33 }
0x1106   :  { %v2141_v35 = vadd.f32 1e-05, %v2139_v34 }
0x1108   :  { %4843 = vrsqrt.f32 %v2141_v35 }
0x1111   :  { %v4842_v36 = vpop.eup %4841 }
0x1112   :  { %v2144_v38 = vmul.f32 %v4842_v36, %v2128_v20 }
0x1114   :  { %v2153_v40 = vmul.f32 %v4294_v37, %v2144_v38 }
0x1115   :  { %v4844_v41 = vpop.eup %4843 }
0x1116   :  { %v2145_v42 = vmul.f32 %v4844_v41, %v2129_v19  ;;  %v2162_v43 = vadd.f32 %v4295_v39, %v2153_v40 }
0x1118   :  { %v2154_v44 = vmul.f32 %v4294_v37, %v2145_v42  ;;  %v5346_v45 = vmul.f32 %v2162_v43, %v5291_v52  ;;  %v4305_v42 = vld [vmem:[%s5618_s6 + $0x1] ss:$0 sm:$0xff] }
0x111a   :  { %v2163_v46 = vadd.f32 %v4295_v39, %v2154_v44  ;;  %4651 = vmatprep.mubr.msk.f32.mxu0 %vm123_vm0, %v5346_v45 }
0x111c   :  { %v5351_v47 = vmul.f32 %v2163_v46, %v5293_v53 }
0x111e   :  { %4652 = vmatmul.mubr.msk.f32.vlgmr.msra.gmra.mxu0 %vm123_vm0, %v5351_v47  ;;  %v2269_v43 = vadd.f32 %v4305_v42, %v5351_v47 }
0x111f   :  { %4656 = vmatprep.mubr.msk.f32.mxu0 %vm4931_vm1, %v4930_v6 }
0x11de   :  { %v4653_v49 = vpop.f32.mrf.mxu0 }
0x11df   :  { %v5360_v50 = vadd.f32 %v4653_v49, %v4301_v48 }
0x11e0   :  { %v2251_v51 = vpop.f32.mrf.mxu0 }
0x11e1   :  { %v5362_v54 = vadd.f32 %v4301_v48, %v2251_v51  ;;  %2348 = vrot.lane.b32.xlu0 %v5360_v50, %s4932_s20  ;;  %v2268_v48 = vadd.f32 %v4305_v42, %v5346_v45 }
0x11e3   :  { %2271 = vrot.lane.b32.xlu1 %v5362_v54, %s4932_s20 }
0x1253   :  { %v2349_v55 = vpop.permute.xlu0 %2348 }
0x1254   :  { %4660 = vmatpush3.xpose.msk.msra.mxu1 %vm217_vm2, %v2349_v55 }
0x1255   :  { %v2272_v56 = vpop.permute.xlu1 %2271  ;;  %4669 = vmatprep.subr.mxu1 %v4930_v6 }
0x1256   :  { %4655 = vmatpush3.xpose.msk.msra.mxu0 %vm217_vm2, %v2272_v56 }
0x1257   :  { %4662 = vmatmul.mubr.msk.f32.vlgmr.msra.gmra.mxu1 %vm217_vm2, %v5360_v50  ;;  %4664 = vmatprep.subr.mxu0 %v4930_v6 }
0x1258   :  { %4671 = vmatprep.mubr.msk.f32.mxu1 %vm4931_vm1, %v4930_v6 }
0x1259   :  { %4657 = vmatmul.mubr.msk.f32.vlgmr.msra.gmra.mxu0 %vm217_vm2, %v5362_v54 }
0x125a   :  { %4666 = vmatprep.mubr.msk.f32.mxu0 %vm4931_vm1, %v4930_v6 }
0x1317   :  { %v2420_v57 = vpop.f32.mrf.mxu1 }
0x1318   :  { %v2421_v58 = vadd.f32 %v2420_v57, %v5089_v30 }
0x1319   :  { %v2343_v59 = vpop.f32.mrf.mxu0  ;;  %v4663_v60 = vpop.f32.mrf.mxu1 }
0x131a   :  { %v2344_v10 = vadd.f32 %v2343_v59, %v5086_v26  ;;  %v2427_v61 = vsel %vm217_vm2, %v2421_v58, -inf }
0x131b   :  { %2428 = vmax.xlane.f32.xlu0 %v2427_v61  ;;  %v4658_v62 = vpop.f32.mrf.mxu0 }
0x131c   :  { %v2424_v63 = vsel %vm217_vm2, %v2344_v10, -inf }
0x131d   :  { %2425 = vmax.xlane.f32.xlu1 %v2424_v63 }
0x1331   :  { %2524 = vrot.lane.b32.xlu0 %v5360_v50, %s4934_s21 }
0x13a4   :  { %v2429_v0 = vpop.xlane.xlu0 %2428 }
0x13a5   :  { %v2431_v1 = vsub.f32 %v2421_v58, %v2429_v0 }
0x13a6   :  { %v2426_v3 = vpop.xlane.xlu1 %2425 }
0x13a7   :  { %v2434_v4 = vmul.f32 1.442695, %v2431_v1  ;;  %v2430_v11 = vsub.f32 %v2344_v10, %v2426_v3  ;;  %v4321_v3 = vld [vmem:[%s5617_s5 + $0x28] sm:$0xff] }
0x13a8   :  { %v2525_v7 = vpop.permute.xlu0 %2524 }
0x13a9   :  { %4845 = vpow2.f32 %v2434_v4  ;;  %v2432_v5 = vmul.f32 1.442695, %v2430_v11  ;;  %4670 = vmatpush3.msra.mxu1 %v2525_v7 }
0x13aa   :  { %4679 = vmatprep.subr.mxu1 %v4930_v6 }
0x13ab   :  { %4847 = vpow2.f32 %v2432_v5 }
0x13b6   :  { %v4846_v8 = vpop.eup %4845 }
0x13b7   :  { %v2439_v9 = vsel %vm217_vm2, %v4846_v8, 0.0 }
0x13b8   :  { %v4848_v12 = vpop.eup %4847  ;;  %2440 = vadd.xlane.f32.xlu1 %v2439_v9 }
0x13b9   :  { %v2436_v13 = vsel %vm217_vm2, %v4848_v12, 0.0 }
0x13bc   :  { %2437 = vadd.xlane.f32.xlu1 %v2436_v13 }
0x13cd   :  { %2448 = vrot.lane.b32.xlu1 %v5362_v54, %s4934_s21 }
0x13d1   :  { %2687 = vrot.lane.b32.xlu1 %v5362_v54, %s4936_s23 }
0x13d5   :  { %2765 = vrot.lane.b32.xlu1 %v5360_v50, %s4936_s23 }
0x13d9   :  { %2685 = vrot.lane.b32.xlu1 %v5362_v54, %s4935_s22 }
0x13dd   :  { %2763 = vrot.lane.b32.xlu1 %v5360_v50, %s4935_s22 }
0x1441   :  { %v2441_v14 = vpop.xlane.xlu1 %2440 }
0x1442   :  { %v2443_v15 = vmax.f32 %v2441_v14, 1e-06 }
0x1444   :  { %4849 = vrcp.f32 %v2443_v15 }
0x1445   :  { %v2438_v16 = vpop.xlane.xlu1 %2437 }
0x1446   :  { %v2442_v17 = vmax.f32 %v2438_v16, 1e-06 }
0x1448   :  { %4851 = vrcp.f32 %v2442_v17 }
0x1449   :  { %v2449_v18 = vpop.permute.xlu1 %2448 }
0x144a   :  { %4665 = vmatpush3.msra.mxu0 %v2449_v18 }
0x144b   :  { %4674 = vmatprep.subr.mxu0 %v4312_v25 }
0x144d   :  { %v2688_v19 = vpop.permute.xlu1 %2687 }
0x1451   :  { %v4850_v20 = vpop.eup %4849  ;;  %v2766_v21 = vpop.permute.xlu1 %2765 }
0x1452   :  { %v2447_v22 = vmul.f32 %v4850_v20, %v4846_v8 }
0x1454   :  { %4672 = vmatmul.mubr.msk.f32.vlgmr.msra.gmra.mxu1 %vm217_vm2, %v2447_v22 }
0x1455   :  { %v4852_v23 = vpop.eup %4851  ;;  %4680 = vmatpush3.xpose.msk.msra.mxu1 %vm217_vm2, %v2688_v19  ;;  %4681 = vmatprep.mubr.msk.f32.mxu1 %vm4931_vm1, %v4930_v6  ;;  %v2686_v2 = vpop.permute.xlu1 %2685 }
0x1456   :  { %v2446_v24 = vmul.f32 %v4852_v23, %v4848_v12  ;;  %4689 = vmatprep.subr.mxu1 %v4930_v6 }
0x1458   :  { %4667 = vmatmul.mubr.msk.f32.vlgmr.msra.gmra.mxu0 %vm217_vm2, %v2446_v24  ;;  %4682 = vmatmul.mubr.msk.f32.vlgmr.msra.gmra.mxu1 %vm217_vm2, %v2686_v2 }
0x1459   :  { %4691 = vmatprep.mubr.msk.f32.mxu1 %vm4931_vm1, %v4930_v6  ;;  %4675 = vmatpush3.msra.mxu0 %v4312_v25  ;;  %v2764_v36 = vpop.permute.xlu1 %2763 }
0x145a   :  { %4684 = vmatprep.subr.mxu0 %v4930_v6 }
0x1514   :  { %v2596_v27 = vpop.f32.mrf.mxu1 }
0x1516   :  { %v4673_v28 = vpop.f32.mrf.mxu1 }
0x1518   :  { %v2520_v29 = vpop.f32.mrf.mxu0  ;;  %v2759_v31 = vpop.f32.mrf.mxu1 }
0x1519   :  { %v2760_v32 = vadd.f32 %v2759_v31, %v5086_v26  ;;  %4676 = vmatprep.mubr.msk.f32.mxu0 %vm217_vm2, %v2520_v29 }
0x151a   :  { %v4668_v33 = vpop.f32.mrf.mxu0  ;;  %4677 = vmatmul.mubr.msk.f32.vlgmr.msra.gmra.mxu0 %vm217_vm2, %v2596_v27  ;;  %v4683_v34 = vpop.f32.mrf.mxu1 }
0x151b   :  { %4685 = vmatpush3.xpose.msk.msra.mxu0 %vm217_vm2, %v2766_v21  ;;  %v2841_v35 = vsel %vm217_vm2, %v2760_v32, -inf  ;;  %4686 = vmatprep.mubr.msk.f32.mxu0 %vm4931_vm1, %v4930_v6 }
0x151c   :  { %2842 = vmax.xlane.f32.xlu0 %v2841_v35  ;;  %4694 = vmatprep.subr.mxu0 %v4930_v6 }
0x151e   :  { %4687 = vmatmul.mubr.msk.f32.vlgmr.msra.gmra.mxu0 %vm217_vm2, %v2764_v36 }
0x151f   :  { %4696 = vmatprep.mubr.msk.f32.mxu0 %vm4931_vm1, %v4930_v6 }
0x15a5   :  { %v2843_v37 = vpop.xlane.xlu0 %2842 }
0x15a6   :  { %v2847_v38 = vsub.f32 %v2760_v32, %v2843_v37 }
0x15a8   :  { %v2849_v39 = vmul.f32 1.442695, %v2847_v38 }
0x15aa   :  { %4853 = vpow2.f32 %v2849_v39 }
0x15b7   :  { %v4854_v40 = vpop.eup %4853 }
0x15b8   :  { %v2853_v41 = vsel %vm217_vm2, %v4854_v40, 0.0 }
0x15b9   :  { %2854 = vadd.xlane.f32.xlu0 %v2853_v41 }
0x15da   :  { %v4678_v44 = vpop.f32.mrf.mxu0 }
0x15db   :  { %v5428_v46 = vadd.f32 %v4678_v44, %v2269_v43 }
0x15dc   :  { %v2674_v49 = vpop.f32.mrf.mxu0 }
0x15dd   :  { %v5431_v51 = vadd.f32 %v2674_v49, %v2268_v48  ;;  %v4330_v49 = vld [vmem:[%s5617_s5 + $0x30] sm:$0xff] }
0x15de   :  { %v2837_v55 = vpop.f32.mrf.mxu0 }
0x15df   :  { %v2838_v56 = vadd.f32 %v2837_v55, %v5089_v30 }
0x15e0   :  { %v4688_v57 = vpop.f32.mrf.mxu0 }
0x15e1   :  { %v2844_v58 = vsel %vm217_vm2, %v2838_v56, -inf }
0x15e2   :  { %2845 = vmax.xlane.f32.xlu1 %v2844_v58 }
0x15f3   :  { %2865 = vrot.lane.b32.xlu1 %v5362_v54, %s4937_s28 }
0x15f7   :  { %3104 = vrot.lane.b32.xlu1 %v5362_v54, %s4939_s1 }
0x15fb   :  { %3182 = vrot.lane.b32.xlu1 %v5360_v50, %s4939_s1 }
0x15ff   :  { %3180 = vrot.lane.b32.xlu1 %v5360_v50, %s4938_s29 }
0x1642   :  { %v2855_v45 = vpop.xlane.xlu0 %2854 }
0x1643   :  { %v2859_v47 = vmax.f32 %v2855_v45, 1e-06 }
0x1645   :  { %4855 = vrcp.f32 %v2859_v47 }
0x1652   :  { %v4856_v60 = vpop.eup %4855 }
0x1653   :  { %v2863_v63 = vmul.f32 %v4856_v60, %v4854_v40 }
0x166b   :  { %v2846_v59 = vpop.xlane.xlu1 %2845 }
0x166c   :  { %v2848_v10 = vsub.f32 %v2838_v56, %v2846_v59 }
0x166e   :  { %v2851_v61 = vmul.f32 1.442695, %v2848_v10 }
0x166f   :  { %v2866_v62 = vpop.permute.xlu1 %2865 }
0x1670   :  { %4857 = vpow2.f32 %v2851_v61  ;;  %4690 = vmatpush3.msra.mxu1 %v2866_v62 }
0x1671   :  { %4692 = vmatmul.mubr.msk.f32.vlgmr.msra.gmra.mxu1 %vm217_vm2, %v2863_v63  ;;  %4699 = vmatprep.subr.mxu1 %v4321_v3 }
0x1672   :  { %4700 = vmatpush3.msra.mxu1 %v4321_v3 }
0x1673   :  { %4709 = vmatprep.subr.mxu1 %v4930_v6  ;;  %v3105_v9 = vpop.permute.xlu1 %3104 }
0x1677   :  { %v3183_v15 = vpop.permute.xlu1 %3182 }
0x167b   :  { %v3181_v18 = vpop.permute.xlu1 %3180 }
0x167d   :  { %v4858_v0 = vpop.eup %4857 }
0x167e   :  { %v2856_v1 = vsel %vm217_vm2, %v4858_v0, 0.0 }
0x167f   :  { %2857 = vadd.xlane.f32.xlu0 %v2856_v1 }
0x1695   :  { %2941 = vrot.lane.b32.xlu0 %v5360_v50, %s4937_s28  ;;  %s5632_s28 = smov 104  }
0x1699   :  { %3102 = vrot.lane.b32.xlu0 %v5362_v54, %s4938_s29 }
0x1708   :  { %v2858_v4 = vpop.xlane.xlu0 %2857 }
0x1709   :  { %v2860_v11 = vmax.f32 %v2858_v4, 1e-06 }
0x170b   :  { %4859 = vrcp.f32 %v2860_v11 }
0x170c   :  { %v2942_v7 = vpop.permute.xlu0 %2941 }
0x170d   :  { %4695 = vmatpush3.msra.mxu0 %v2942_v7 }
0x170e   :  { %4704 = vmatprep.subr.mxu0 %v4930_v6 }
0x1710   :  { %v3103_v12 = vpop.permute.xlu0 %3102 }
0x1718   :  { %v4860_v5 = vpop.eup %4859 }
0x1719   :  { %v2864_v8 = vmul.f32 %v4860_v5, %v4858_v0 }
0x171b   :  { %4697 = vmatmul.mubr.msk.f32.vlgmr.msra.gmra.mxu0 %vm217_vm2, %v2864_v8 }
0x171c   :  { %4705 = vmatpush3.xpose.msk.msra.mxu0 %vm217_vm2, %v3105_v9  ;;  %4706 = vmatprep.mubr.msk.f32.mxu0 %vm4931_vm1, %v4930_v6 }
0x171d   :  { %4714 = vmatprep.subr.mxu0 %v4930_v6 }
0x171f   :  { %4707 = vmatmul.mubr.msk.f32.vlgmr.msra.gmra.mxu0 %vm217_vm2, %v3103_v12 }
0x1720   :  { %4716 = vmatprep.mubr.msk.f32.mxu0 %vm4931_vm1, %v4930_v6 }
0x1731   :  { %v2937_v13 = vpop.f32.mrf.mxu1 }
0x1732   :  { %4701 = vmatprep.mubr.msk.f32.mxu1 %vm217_vm2, %v2937_v13 }
0x1733   :  { %v4693_v14 = vpop.f32.mrf.mxu1 }
0x17db   :  { %v3013_v16 = vpop.f32.mrf.mxu0 }
0x17dc   :  { %4702 = vmatmul.mubr.msk.f32.vlgmr.msra.gmra.mxu1 %vm217_vm2, %v3013_v16 }
0x17dd   :  { %4710 = vmatpush3.xpose.msk.msra.mxu1 %vm217_vm2, %v3183_v15  ;;  %v4698_v17 = vpop.f32.mrf.mxu0  ;;  %4711 = vmatprep.mubr.msk.f32.mxu1 %vm4931_vm1, %v4930_v6 }
0x17de   :  { %4719 = vmatprep.subr.mxu1 %v4930_v6 }
0x17df   :  { %v3176_v19 = vpop.f32.mrf.mxu0 }
0x17e0   :  { %v3177_v20 = vadd.f32 %v3176_v19, %v5086_v26  ;;  %4712 = vmatmul.mubr.msk.f32.vlgmr.msra.gmra.mxu1 %vm217_vm2, %v3181_v18 }
0x17e1   :  { %v4708_v21 = vpop.f32.mrf.mxu0  ;;  %4721 = vmatprep.mubr.msk.f32.mxu1 %vm4931_vm1, %v4930_v6 }
0x17e2   :  { %v3258_v22 = vsel %vm217_vm2, %v3177_v20, -inf }
0x17e3   :  { %3259 = vmax.xlane.f32.xlu0 %v3258_v22 }
0x186c   :  { %v3260_v23 = vpop.xlane.xlu0 %3259 }
0x186d   :  { %v3264_v24 = vsub.f32 %v3177_v20, %v3260_v23 }
0x186f   :  { %v3266_v2 = vmul.f32 1.442695, %v3264_v24 }
0x1871   :  { %4861 = vpow2.f32 %v3266_v2 }
0x187e   :  { %v4862_v25 = vpop.eup %4861 }
0x187f   :  { %v3270_v27 = vsel %vm217_vm2, %v4862_v25, 0.0 }
0x1880   :  { %3271 = vadd.xlane.f32.xlu0 %v3270_v27 }
0x189c   :  { %v4703_v28 = vpop.f32.mrf.mxu1 }
0x189d   :  { %v5475_v29 = vadd.f32 %v4703_v28, %v5428_v46 }
0x189e   :  { %v3091_v31 = vpop.f32.mrf.mxu1 }
0x189f   :  { %v5478_v32 = vadd.f32 %v3091_v31, %v5431_v51 }
0x18a0   :  { %v3254_v33 = vpop.f32.mrf.mxu1 }
0x18a1   :  { %v3255_v34 = vadd.f32 %v3254_v33, %v5089_v30 }
0x18a2   :  { %v4713_v35 = vpop.f32.mrf.mxu1 }
0x18a3   :  { %v3261_v36 = vsel %vm217_vm2, %v3255_v34, -inf }
0x18a4   :  { %3262 = vmax.xlane.f32.xlu1 %v3261_v36 }
0x18b5   :  { %3282 = vrot.lane.b32.xlu1 %v5362_v54, %s4940_s17 }
0x18b9   :  { %3521 = vrot.lane.b32.xlu1 %v5362_v54, %s4941_s18 }
0x18bd   :  { %3599 = vrot.lane.b32.xlu1 %v5360_v50, %s4941_s18 }
0x18c1   :  { %3597 = vrot.lane.b32.xlu1 %v5360_v50, %s5632_s28 }
0x1909   :  { %v3272_v37 = vpop.xlane.xlu0 %3271 }
0x190a   :  { %v3276_v38 = vmax.f32 %v3272_v37, 1e-06 }
0x190c   :  { %4863 = vrcp.f32 %v3276_v38 }
0x1919   :  { %v4864_v40 = vpop.eup %4863 }
0x191a   :  { %v3280_v44 = vmul.f32 %v4864_v40, %v4862_v25 }
0x192d   :  { %v3263_v39 = vpop.xlane.xlu1 %3262 }
0x192e   :  { %v3265_v41 = vsub.f32 %v3255_v34, %v3263_v39 }
0x1930   :  { %v3268_v42 = vmul.f32 1.442695, %v3265_v41 }
0x1931   :  { %v3283_v43 = vpop.permute.xlu1 %3282 }
0x1932   :  { %4865 = vpow2.f32 %v3268_v42  ;;  %4715 = vmatpush3.msra.mxu0 %v3283_v43 }
0x1933   :  { %4717 = vmatmul.mubr.msk.f32.vlgmr.msra.gmra.mxu0 %vm217_vm2, %v3280_v44  ;;  %4724 = vmatprep.subr.mxu0 %v4330_v49 }
0x1934   :  { %4725 = vmatpush3.msra.mxu0 %v4330_v49 }
0x1935   :  { %4734 = vmatprep.subr.mxu0 %v4930_v6  ;;  %v3522_v45 = vpop.permute.xlu1 %3521 }
0x1939   :  { %v3600_v10 = vpop.permute.xlu1 %3599 }
0x193d   :  { %v3598_v63 = vpop.permute.xlu1 %3597 }
0x193f   :  { %v4866_v46 = vpop.eup %4865 }
0x1940   :  { %v3273_v48 = vsel %vm217_vm2, %v4866_v46, 0.0 }
0x1941   :  { %3274 = vadd.xlane.f32.xlu0 %v3273_v48 }
0x1957   :  { %3358 = vrot.lane.b32.xlu0 %v5360_v50, %s4940_s17  ;;  %s5633_s17 = smov 40  }
0x195b   :  { %3519 = vrot.lane.b32.xlu0 %v5362_v54, %s5632_s28 }
0x19ca   :  { %v3275_v51 = vpop.xlane.xlu0 %3274 }
0x19cb   :  { %v3277_v55 = vmax.f32 %v3275_v51, 1e-06 }
0x19cd   :  { %4867 = vrcp.f32 %v3277_v55 }
0x19ce   :  { %v3359_v56 = vpop.permute.xlu0 %3358 }
0x19cf   :  { %4720 = vmatpush3.msra.mxu1 %v3359_v56 }
0x19d0   :  { %4729 = vmatprep.subr.mxu1 %v4930_v6 }
0x19d2   :  { %v3520_v47 = vpop.permute.xlu0 %3519 }
0x19da   :  { %v4868_v57 = vpop.eup %4867 }
0x19db   :  { %v3281_v58 = vmul.f32 %v4868_v57, %v4866_v46 }
0x19dd   :  { %4722 = vmatmul.mubr.msk.f32.vlgmr.msra.gmra.mxu1 %vm217_vm2, %v3281_v58  ;;  %v4349_v58 = vld [vmem:[%s5621_s9 + $0x38] sm:$0xff] }
0x19de   :  { %4730 = vmatpush3.xpose.msk.msra.mxu1 %vm217_vm2, %v3522_v45  ;;  %4731 = vmatprep.mubr.msk.f32.mxu1 %vm4931_vm1, %v4930_v6  ;;  %v4348_v45 = vld [vmem:[%s5621_s9 + $0x30] sm:$0xff] }
0x19df   :  { %4739 = vmatprep.subr.mxu1 %v4930_v6 }
0x19e1   :  { %4732 = vmatmul.mubr.msk.f32.vlgmr.msra.gmra.mxu1 %vm217_vm2, %v3520_v47  ;;  %v4347_v47 = vld [vmem:[%s5621_s9 + $0x28] sm:$0xff] }
0x19e2   :  { %4741 = vmatprep.mubr.msk.f32.mxu1 %vm4931_vm1, %v4930_v6 }
0x19f3   :  { %v3354_v59 = vpop.f32.mrf.mxu0 }
0x19f4   :  { %4726 = vmatprep.mubr.msk.f32.mxu0 %vm217_vm2, %v3354_v59  ;;  %v4346_v59 = vld [vmem:[%s5621_s9 + $0x20] sm:$0xff] }
0x19f5   :  { %v4718_v60 = vpop.f32.mrf.mxu0 }
0x19f6   :  { %v4361_v60 = vld [vmem:[%s5623_s11 + $0x78] sm:$0xff] }
0x1a9d   :  { %v3430_v61 = vpop.f32.mrf.mxu1 }
0x1a9e   :  { %4727 = vmatmul.mubr.msk.f32.vlgmr.msra.gmra.mxu0 %vm217_vm2, %v3430_v61  ;;  %v4359_v61 = vld [vmem:[%s5623_s11 + $0x68] sm:$0xff] }
0x1a9f   :  { %4735 = vmatpush3.xpose.msk.msra.mxu0 %vm217_vm2, %v3600_v10  ;;  %v4723_v62 = vpop.f32.mrf.mxu1  ;;  %4736 = vmatprep.mubr.msk.f32.mxu0 %vm4931_vm1, %v4930_v6  ;;  %v4360_v10 = vld [vmem:[%s5623_s11 + $0x70] sm:$0xff] }
0x1aa0   :  { %4744 = vmatprep.subr.mxu0 %v4930_v6  ;;  %v4358_v62 = vld [vmem:[%s5623_s11 + $0x60] sm:$0xff] }
0x1aa1   :  { %v3593_v0 = vpop.f32.mrf.mxu1 }
0x1aa2   :  { %v3594_v1 = vadd.f32 %v3593_v0, %v5086_v26  ;;  %4737 = vmatmul.mubr.msk.f32.vlgmr.msra.gmra.mxu0 %vm217_vm2, %v3598_v63 }
0x1aa3   :  { %v4733_v3 = vpop.f32.mrf.mxu1  ;;  %4746 = vmatprep.mubr.msk.f32.mxu0 %vm4931_vm1, %v4930_v6 }
0x1aa4   :  { %v3675_v4 = vsel %vm217_vm2, %v3594_v1, -inf }
0x1aa5   :  { %3676 = vmax.xlane.f32.xlu0 %v3675_v4 }
0x1b2e   :  { %v3677_v11 = vpop.xlane.xlu0 %3676 }
0x1b2f   :  { %v3681_v7 = vsub.f32 %v3594_v1, %v3677_v11 }
0x1b31   :  { %v3683_v5 = vmul.f32 1.442695, %v3681_v7 }
0x1b33   :  { %4869 = vpow2.f32 %v3683_v5  ;;  %v4343_v5 = vld [vmem:[%s5619_s7 + $0x1] ss:$0 sm:$0xff] }
0x1b40   :  { %v4870_v8 = vpop.eup %4869 }
0x1b41   :  { %v3687_v9 = vsel %vm217_vm2, %v4870_v8, 0.0 }
0x1b42   :  { %3688 = vadd.xlane.f32.xlu0 %v3687_v9 }
0x1b5e   :  { %v4728_v12 = vpop.f32.mrf.mxu0 }
0x1b5f   :  { %v3518_v26 = vadd.f32 %v4728_v12, %v5475_v29 }
0x1b60   :  { %v3508_v13 = vpop.f32.mrf.mxu0 }
0x1b61   :  { %v3517_v14 = vadd.f32 %v3508_v13, %v5478_v32  ;;  %v4345_v13 = vld [vmem:[%s5620_s8 + $0x1] ss:$0 sm:$0xff] }
0x1b62   :  { %v3671_v15 = vpop.f32.mrf.mxu0 }
0x1b63   :  { %v3672_v6 = vadd.f32 %v3671_v15, %v5089_v30 }
0x1b64   :  { %v4738_v16 = vpop.f32.mrf.mxu0 }
0x1b65   :  { %v3678_v17 = vsel %vm217_vm2, %v3672_v6, -inf }
0x1b66   :  { %3679 = vmax.xlane.f32.xlu1 %v3678_v17 }
0x1b77   :  { %3699 = vrot.lane.b32.xlu1 %v5362_v54, %s5633_s17  ;;  %v4339_v54 = vld [vmem:[%s5617_s5 + $0x38] sm:$0xff] }
0x1bcb   :  { %v3689_v18 = vpop.xlane.xlu0 %3688 }
0x1bcc   :  { %v3693_v19 = vmax.f32 %v3689_v18, 1e-06  ;;  %v4357_v18 = vld [vmem:[%s5623_s11 + $0x58] sm:$0xff] }
0x1bce   :  { %4871 = vrcp.f32 %v3693_v19  ;;  %v4356_v19 = vld [vmem:[%s5623_s11 + $0x50] sm:$0xff] }
0x1bdb   :  { %v4872_v21 = vpop.eup %4871 }
0x1bdc   :  { %v3697_v2 = vmul.f32 %v4872_v21, %v4870_v8  ;;  %v4354_v21 = vld [vmem:[%s5623_s11 + $0x40] sm:$0xff] }
0x1bef   :  { %v3680_v20 = vpop.xlane.xlu1 %3679 }
0x1bf0   :  { %v3682_v22 = vsub.f32 %v3672_v6, %v3680_v20  ;;  %v4355_v20 = vld [vmem:[%s5623_s11 + $0x48] sm:$0xff] }
0x1bf2   :  { %v3685_v23 = vmul.f32 1.442695, %v3682_v22  ;;  %v4351_v22 = vld [vmem:[%s5622_s10 + $0x1] ss:$0 sm:$0xff] }
0x1bf3   :  { %v3700_v24 = vpop.permute.xlu1 %3699 }
0x1bf4   :  { %4873 = vpow2.f32 %v3685_v23  ;;  %4740 = vmatpush3.msra.mxu1 %v3700_v24 }
0x1bf5   :  { %4742 = vmatmul.mubr.msk.f32.vlgmr.msra.gmra.mxu1 %vm217_vm2, %v3697_v2  ;;  %4749 = vmatprep.subr.mxu1 %v4339_v54 }
0x1bf6   :  { %4750 = vmatpush3.msra.mxu1 %v4339_v54 }
0x1bf7   :  { %4765 = vmatprep.subr.mxu1 %v4361_v60 }
0x1c01   :  { %v4874_v30 = vpop.eup %4873 }
0x1c02   :  { %v3690_v25 = vsel %vm217_vm2, %v4874_v30, 0.0 }
0x1c03   :  { %3691 = vadd.xlane.f32.xlu0 %v3690_v25 }
0x1c19   :  { %3775 = vrot.lane.b32.xlu0 %v5360_v50, %s5633_s17 }
0x1c8c   :  { %v3692_v27 = vpop.xlane.xlu0 %3691 }
0x1c8d   :  { %v3694_v28 = vmax.f32 %v3692_v27, 1e-06  ;;  %v4363_v27 = vld [vmem:[%s5624_s12 + $0x1] ss:$0 sm:$0xff] }
0x1c8f   :  { %4875 = vrcp.f32 %v3694_v28 }
0x1c90   :  { %v3776_v29 = vpop.permute.xlu0 %3775 }
0x1c91   :  { %4745 = vmatpush3.msra.mxu0 %v3776_v29 }
0x1c92   :  { %4754 = vmatprep.subr.mxu0 %v4349_v58 }
0x1c9c   :  { %v4876_v31 = vpop.eup %4875 }
0x1c9d   :  { %v3698_v32 = vmul.f32 %v4876_v31, %v4874_v30 }
0x1c9f   :  { %4747 = vmatmul.mubr.msk.f32.vlgmr.msra.gmra.mxu0 %vm217_vm2, %v3698_v32 }
0x1ca0   :  { %4755 = vmatpush3.msra.mxu0 %v4349_v58 }
0x1ca1   :  { %4756 = vmatprep.subr.mxu0 %v4348_v45 }
0x1ca2   :  { %4757 = vmatpush3.msra.mxu0 %v4348_v45  ;;  %v4367_v45 = vld [vmem:[%s5625_s13 + $0x1] ss:$0 sm:$0xff]  ;;  %s4905_s13 = scalar_lea.vmem %s4236_s26, 256 }
0x1ca3   :  { %4758 = vmatprep.subr.mxu0 %v4347_v47  ;;  %p4906_p5 = scmp.ne.s32.totalorder %s4236_s26, %s4905_s13  ;;  %p4911_p7 = scmp.lt.s32.totalorder %s4905_s13, %s4905_s13 }
0x1ca4   :  { %4759 = vmatpush3.msra.mxu0 %v4347_v47 }
0x1ca5   :  { %4760 = vmatprep.subr.mxu0 %v4346_v59  ;;  %p4912_p8 = por %p4911_p7, %p4910_p6 }
0x1ca6   :  { %4761 = vmatpush3.msra.mxu0 %v4346_v59 }
0x1ca7   :  { %p4913_p9 = pnand %p4912_p8, %p4906_p5 }
0x1cb5   :  { %v3771_v33 = vpop.f32.mrf.mxu1 }
0x1cb6   :  { %4751 = vmatprep.mubr.msk.f32.mxu1 %vm217_vm2, %v3771_v33 }
0x1cb7   :  { %v4743_v34 = vpop.f32.mrf.mxu1 }
0x1d5f   :  { %v3847_v50 = vpop.f32.mrf.mxu0 }
0x1d60   :  { %4752 = vmatmul.mubr.msk.f32.vlgmr.msra.gmra.mxu1 %vm217_vm2, %v3847_v50 }
0x1d61   :  { %v4748_v35 = vpop.f32.mrf.mxu0  ;;  %4766 = vmatpush3.msra.mxu1 %v4361_v60  ;;  %v4369_v60 = vld [vmem:[%s5626_s14 + $0x1] ss:$0 sm:$0xff] }
0x1d62   :  { %4767 = vmatprep.subr.mxu1 %v4360_v10 }
0x1d63   :  { %4768 = vmatpush3.msra.mxu1 %v4360_v10 }
0x1d64   :  { %4769 = vmatprep.subr.mxu1 %v4359_v61 }
0x1d65   :  { %4770 = vmatpush3.msra.mxu1 %v4359_v61 }
0x1d66   :  { %4771 = vmatprep.subr.mxu1 %v4358_v62 }
0x1d67   :  { %4772 = vmatpush3.msra.mxu1 %v4358_v62 }
0x1d68   :  { %4773 = vmatprep.subr.mxu1 %v4357_v18 }
0x1d69   :  { %4774 = vmatpush3.msra.mxu1 %v4357_v18 }
0x1d6a   :  { %4775 = vmatprep.subr.mxu1 %v4356_v19 }
0x1d6b   :  { %4776 = vmatpush3.msra.mxu1 %v4356_v19 }
0x1d6c   :  { %4777 = vmatprep.subr.mxu1 %v4355_v20 }
0x1d6d   :  { %4778 = vmatpush3.msra.mxu1 %v4355_v20 }
0x1d6e   :  { %4779 = vmatprep.subr.mxu1 %v4354_v21 }
0x1d6f   :  { %4780 = vmatpush3.msra.mxu1 %v4354_v21 }
0x1e20   :  { %v4753_v36 = vpop.f32.mrf.mxu1 }
0x1e21   :  { %v3935_v37 = vadd.f32 %v4753_v36, %v3518_v26 }
0x1e22   :  { %v3925_v38 = vpop.f32.mrf.mxu1 }
0x1e23   :  { %v3934_v39 = vadd.f32 %v3925_v38, %v3517_v14  ;;  %v3939_v40 = vsel %vm123_vm0, %v3935_v37, 0.0 }
0x1e24   :  { %3940 = vadd.xlane.f32.xlu0 %v3939_v40 }
0x1e25   :  { %v3936_v41 = vsel %vm123_vm0, %v3934_v39, 0.0 }
0x1e26   :  { %3937 = vadd.xlane.f32.xlu1 %v3936_v41 }
0x1ead   :  { %v3941_v42 = vpop.xlane.xlu0 %3940 }
0x1eae   :  { %v3943_v43 = vmul.f32 0.03125, %v3941_v42 }
0x1eaf   :  { %v3938_v44 = vpop.xlane.xlu1 %3937 }
0x1eb0   :  { %v3945_v46 = vsub.f32 %v3935_v37, %v3943_v43  ;;  %v3942_v48 = vmul.f32 0.03125, %v3938_v44 }
0x1eb2   :  { %v3944_v49 = vsub.f32 %v3934_v39, %v3942_v48  ;;  %v3947_v51 = vmul.f32 %v3945_v46, %v3945_v46 }
0x1eb4   :  { %v3951_v55 = vsel %vm123_vm0, %v3947_v51, 0.0  ;;  %v3946_v56 = vmul.f32 %v3944_v49, %v3944_v49 }
0x1eb5   :  { %3952 = vadd.xlane.f32.xlu0 %v3951_v55 }
0x1eb6   :  { %v3948_v57 = vsel %vm123_vm0, %v3946_v56, 0.0 }
0x1eb7   :  { %3949 = vadd.xlane.f32.xlu1 %v3948_v57 }
0x1f3e   :  { %v3953_v63 = vpop.xlane.xlu0 %3952 }
0x1f3f   :  { %v3955_v0 = vmul.f32 0.03125, %v3953_v63 }
0x1f40   :  { %v3950_v1 = vpop.xlane.xlu1 %3949 }
0x1f41   :  { %v3957_v3 = vadd.f32 1e-05, %v3955_v0  ;;  %v3954_v4 = vmul.f32 0.03125, %v3950_v1 }
0x1f43   :  { %4877 = vrsqrt.f32 %v3957_v3  ;;  %v3956_v11 = vadd.f32 1e-05, %v3954_v4 }
0x1f45   :  { %4879 = vrsqrt.f32 %v3956_v11 }
0x1f50   :  { %v4878_v7 = vpop.eup %4877 }
0x1f51   :  { %v3961_v8 = vmul.f32 %v4878_v7, %v3945_v46 }
0x1f52   :  { %v4880_v9 = vpop.eup %4879 }
0x1f53   :  { %v3960_v12 = vmul.f32 %v4880_v9, %v3944_v49  ;;  %v3971_v26 = vmul.f32 %v4343_v5, %v3961_v8 }
0x1f55   :  { %v3970_v14 = vmul.f32 %v4343_v5, %v3960_v12  ;;  %v3981_v15 = vadd.f32 %v4345_v13, %v3971_v26 }
0x1f57   :  { %v3980_v6 = vadd.f32 %v4345_v13, %v3970_v14  ;;  %v3983_v17 = vmul.f32 %v3981_v15, %v5293_v53 }
0x1f59   :  { %v3982_v16 = vmul.f32 %v3980_v6, %v5291_v52 }
0x1f5b   :  { %4762 = vmatprep.mubr.msk.f32.mxu0 %vm123_vm0, %v3982_v16 }
0x1f5c   :  { %4763 = vmatmul.mubr.msk.f32.vlgmr.msra.gmra.mxu0 %vm123_vm0, %v3983_v17 }
0x201c   :  { %v4764_v23 = vpop.f32.mrf.mxu0 }
0x201d   :  { %v4075_v24 = vadd.f32 %v4764_v23, %v4351_v22 }
0x201e   :  { %v4069_v2 = vpop.f32.mrf.mxu0 }
0x201f   :  { %v4070_v30 = vadd.f32 %v4351_v22, %v4069_v2  ;;  %v4079_v54 = vmax.f32 %v4075_v24, 0.0 }
0x2021   :  { %v4078_v25 = vmax.f32 %v4070_v30, 0.0 }
0x2023   :  { %4781 = vmatprep.mubr.msk.f32.mxu1 %vm2036_vm3, %v4078_v25 }
0x2024   :  { %4782 = vmatmul.mubr.msk.f32.vlgmr.msra.gmra.mxu1 %vm2036_vm3, %v4079_v54 }
0x20e4   :  { %v4783_v28 = vpop.f32.mrf.mxu1 }
0x20e5   :  { %v4175_v29 = vadd.f32 %v4783_v28, %v4363_v27 }
0x20e6   :  { %v4169_v31 = vpop.f32.mrf.mxu1 }
0x20e7   :  { %v4170_v32 = vadd.f32 %v4363_v27, %v4169_v31  ;;  %v4179_v33 = vadd.f32 %v4175_v29, %v3983_v17 }
0x20e9   :  { %v4178_v34 = vadd.f32 %v4170_v32, %v3982_v16  ;;  %v4183_v50 = vsel %vm123_vm0, %v4179_v33, 0.0 }
0x20ea   :  { %4184 = vadd.xlane.f32.xlu0 %v4183_v50 }
0x20eb   :  { %v4180_v35 = vsel %vm123_vm0, %v4178_v34, 0.0 }
0x20ec   :  { %4181 = vadd.xlane.f32.xlu1 %v4180_v35 }
0x2173   :  { %v4185_v36 = vpop.xlane.xlu0 %4184 }
0x2174   :  { %v4187_v37 = vmul.f32 0.03125, %v4185_v36 }
0x2175   :  { %v4182_v38 = vpop.xlane.xlu1 %4181 }
0x2176   :  { %v4189_v39 = vsub.f32 %v4179_v33, %v4187_v37  ;;  %v4186_v40 = vmul.f32 0.03125, %v4182_v38 }
0x2178   :  { %v4188_v41 = vsub.f32 %v4178_v34, %v4186_v40  ;;  %v4191_v42 = vmul.f32 %v4189_v39, %v4189_v39 }
0x217a   :  { %v4195_v43 = vsel %vm123_vm0, %v4191_v42, 0.0  ;;  %v4190_v44 = vmul.f32 %v4188_v41, %v4188_v41 }
0x217b   :  { %4196 = vadd.xlane.f32.xlu0 %v4195_v43 }
0x217c   :  { %v4192_v46 = vsel %vm123_vm0, %v4190_v44, 0.0 }
0x217d   :  { %4193 = vadd.xlane.f32.xlu1 %v4192_v46 }
0x2204   :  { %v4197_v48 = vpop.xlane.xlu0 %4196 }
0x2205   :  { %v4199_v49 = vmul.f32 0.03125, %v4197_v48 }
0x2206   :  { %v4194_v51 = vpop.xlane.xlu1 %4193 }
0x2207   :  { %v4201_v55 = vadd.f32 1e-05, %v4199_v49  ;;  %v4198_v56 = vmul.f32 0.03125, %v4194_v51 }
0x2209   :  { %4881 = vrsqrt.f32 %v4201_v55  ;;  %v4200_v57 = vadd.f32 1e-05, %v4198_v56 }
0x220b   :  { %4883 = vrsqrt.f32 %v4200_v57 }
0x2216   :  { %v4882_v58 = vpop.eup %4881 }
0x2217   :  { %v4205_v47 = vmul.f32 %v4882_v58, %v4189_v39 }
0x2218   :  { %v4884_v59 = vpop.eup %4883 }
0x2219   :  { %v4215_v10 = vmul.f32 %v4367_v45, %v4205_v47  ;;  %v4204_v61 = vmul.f32 %v4884_v59, %v4188_v41 }
0x221b   :  { %v4214_v62 = vmul.f32 %v4367_v45, %v4204_v61  ;;  %v4225_v63 = vadd.f32 %v4369_v60, %v4215_v10 }
0x221d   :  { %v4224_v0 = vadd.f32 %v4369_v60, %v4214_v62  ;;  %v4227_v1 = vmul.f32 %v4225_v63, %v5293_v53 }
0x221f   :  { %v4226_v3 = vmul.f32 %v4224_v0, %v5291_v52  ;;  %4229 = vst.msk [vmem:[#allocation5 + $0x8] sm:$0xff] %vm123_vm0, %v4227_v1 }
0x2221   :  { %4228 = vst.msk [vmem:[#allocation5] sm:$0xff] %vm123_vm0, %v4226_v3 }
0x2222   :  { %4916 = shalt.err (!%p4913_p9)
}
0x2223   :  { %s4946_s14 = smov 128   ;;  %s4947_s4 = smov 8  }
0x2224   :  { %4241 = dma.vmem_to_hbm [thread:$0]  %s4236_s26, 256, %s5627_s15, [#allocation4], %s4946_s14, %s4946_s14, %s4947_s4  }
0x2225   :  { %4927 = dma.done.wait [#allocation4], 256  }
0x2226   :  { %4928 = vsyncadd [#allocation4], 4294967040 }
0x2227   :  { %4245 = vsyncpa [#allocation3], 1 }
0x2228   :  { %4246 = vsyncpa [#allocation4], 1 }

</bundles_post_ra>
